<compile_context>
chip_gen: v7x
topology: tpu7x:2x2x1
jax: 0.10.0
libtpu: 0.0.40
codegen_flags: <defaults>
</compile_context>

<pallas_src>
import jax
import jax.numpy as jnp
from jax import lax
from jax.experimental import pallas as pl
from jax.experimental.pallas import tpu as pltpu

D_MODEL = 128
N_HEAD = 4
HEAD_DIM = D_MODEL // N_HEAD
D_FF = 128
LN_EPS = 1e-5


def _layer_norm(y, gamma, beta):
    # PyTorch LayerNorm: biased variance, eps inside rsqrt.
    mu = jnp.mean(y, axis=-1, keepdims=True)
    d = y - mu
    var = jnp.mean(d * d, axis=-1, keepdims=True)
    return d * lax.rsqrt(var + LN_EPS) * gamma + beta


def encoder_layer_kernel(
    x_ref,            # (B_BLK, L, E) f32
    wqkv_ref,         # (E, 3E)  bf16  fused in_proj_weight^T (Q cols pre-scaled)
    bqkv_ref,         # (1, 3E)  f32   in_proj_bias (Q part pre-scaled)
    wout_ref,         # (E, E)   bf16  out_proj.weight^T
    bout_ref,         # (1, E)   f32
    g1_ref, bt1_ref,  # (1, E)   f32   norm1 weight / bias
    w1_ref,           # (E, D_FF) bf16 linear1.weight^T
    b1_ref,           # (1, D_FF) f32
    w2_ref,           # (D_FF, E) bf16 linear2.weight^T
    b2_ref,           # (1, E)   f32
    g2_ref, bt2_ref,  # (1, E)   f32   norm2 weight / bias
    o_ref,            # (B_BLK, L, E) f32
):
    bblk, L, E = x_ref.shape
    x = x_ref[...].reshape(bblk * L, E)                     # (BL, E) f32

    # Fused QKV projection on the MXU (bf16 inputs, f32 accumulation).
    qkv = jnp.dot(x.astype(jnp.bfloat16), wqkv_ref[...],
                  preferred_element_type=jnp.float32) + bqkv_ref[...]   # (BL, 3E)

    wout = wout_ref[...]                                    # (E, E) bf16

    # Self-attention per batch element / per head.  The output projection is
    # folded into the head loop (sum_h ctx_h @ Wout^T[h]) so no lane-axis
    # concatenation of head slabs is needed.
    attn_rows = []
    for b in range(bblk):                                   # static, small
        r0 = b * L
        qb = qkv[r0:r0 + L, 0 * E:1 * E]
        kb = qkv[r0:r0 + L, 1 * E:2 * E]
        vb = qkv[r0:r0 + L, 2 * E:3 * E]
        acc = jnp.zeros((L, E), jnp.float32)
        for h in range(N_HEAD):                             # static unrolled
            lo, hi = h * HEAD_DIM, (h + 1) * HEAD_DIM
            qh = qb[:, lo:hi].astype(jnp.bfloat16)
            kh = kb[:, lo:hi].astype(jnp.bfloat16)
            vh = vb[:, lo:hi].astype(jnp.bfloat16)
            # scores = q @ k^T without an explicit transpose.
            s = lax.dot_general(qh, kh, (((1,), (1,)), ((), ())),
                                preferred_element_type=jnp.float32)     # (L, L)
            s = s - jnp.max(s, axis=-1, keepdims=True)
            p = jnp.exp(s)
            p = p * pl.reciprocal(jnp.sum(p, axis=-1, keepdims=True),
                                  approx=True)
            ctx = jnp.dot(p.astype(jnp.bfloat16), vh,
                          preferred_element_type=jnp.float32)           # (L, Hd)
            acc = acc + jnp.dot(ctx.astype(jnp.bfloat16), wout[lo:hi, :],
                                preferred_element_type=jnp.float32)     # (L, E)
        attn_rows.append(acc)
    attn = attn_rows[0] if bblk == 1 else jnp.concatenate(attn_rows, axis=0)
    attn = attn + bout_ref[...]

    # residual + norm1 (f32)
    y = _layer_norm(x + attn, g1_ref[...], bt1_ref[...])

    # feed-forward: linear2(relu(linear1(y)))
    h1 = jnp.dot(y.astype(jnp.bfloat16), w1_ref[...],
                 preferred_element_type=jnp.float32) + b1_ref[...]
    h1 = jnp.maximum(h1, 0.0)
    h2 = jnp.dot(h1.astype(jnp.bfloat16), w2_ref[...],
                 preferred_element_type=jnp.float32) + b2_ref[...]

    # residual + norm2
    out = _layer_norm(y + h2, g2_ref[...], bt2_ref[...])
    o_ref[...] = out.reshape(bblk, L, E).astype(o_ref.dtype)


# ----------------------------------------------------------------------------
# Wrapper-side weight preparation (pre-transpose, fuse, fold attention scale).
# ----------------------------------------------------------------------------
_PARAM_ORDER = ("wqkv_t", "bqkv", "wout_t", "bout", "g1", "bt1",
                "w1_t", "b1", "w2_t", "b2", "g2", "bt2")


def _prep_layer(p):
    scale = 1.0 / jnp.sqrt(jnp.float32(HEAD_DIM))
    wqkv_t = jnp.transpose(p["in_proj_w"].astype(jnp.float32))      # (E, 3E)
    wqkv_t = wqkv_t.at[:, :D_MODEL].multiply(scale)                  # fold 1/sqrt(Hd)
    bqkv = p["in_proj_b"].astype(jnp.float32).reshape(1, 3 * D_MODEL)
    bqkv = bqkv.at[:, :D_MODEL].multiply(scale)
    return {
        "wqkv_t": wqkv_t.astype(jnp.bfloat16),
        "bqkv": bqkv,
        "wout_t": jnp.transpose(p["out_proj_w"]).astype(jnp.bfloat16),
        "bout": p["out_proj_b"].astype(jnp.float32).reshape(1, D_MODEL),
        "g1": p["norm1_w"].astype(jnp.float32).reshape(1, D_MODEL),
        "bt1": p["norm1_b"].astype(jnp.float32).reshape(1, D_MODEL),
        "w1_t": jnp.transpose(p["lin1_w"]).astype(jnp.bfloat16),
        "b1": p["lin1_b"].astype(jnp.float32).reshape(1, D_FF),
        "w2_t": jnp.transpose(p["lin2_w"]).astype(jnp.bfloat16),
        "b2": p["lin2_b"].astype(jnp.float32).reshape(1, D_MODEL),
        "g2": p["norm2_w"].astype(jnp.float32).reshape(1, D_MODEL),
        "bt2": p["norm2_b"].astype(jnp.float32).reshape(1, D_MODEL),
    }


def _encoder_layer_ble(x_ble, prepped, b_blk):
    B, L, E = x_ble.shape
    assert B % b_blk == 0
    param_list = [prepped[k] for k in _PARAM_ORDER]

    def full_spec(shape):
        n = len(shape)
        return pl.BlockSpec(shape, lambda b, _n=n: (0,) * _n)

    in_specs = [pl.BlockSpec((b_blk, L, E), lambda b: (b, 0, 0))]
    in_specs += [full_spec(p.shape) for p in param_list]

    return pl.pallas_call(
        encoder_layer_kernel,
        out_shape=jax.ShapeDtypeStruct((B, L, E), jnp.float32),
        grid_spec=pltpu.PrefetchScalarGridSpec(
            num_scalar_prefetch=0,
            grid=(B // b_blk,),
            in_specs=in_specs,
            out_specs=pl.BlockSpec((b_blk, L, E), lambda b: (b, 0, 0)),
        ),
        compiler_params=pltpu.CompilerParams(
            dimension_semantics=("parallel",)),
    )(x_ble, *param_list)


def transformer_encoder_ble(x_ble, layers_params, b_blk=None):
    """Apply the TransformerEncoder stack on (B, L, E) batch-first data."""
    B, L, E = x_ble.shape
    if b_blk is None:
        b_blk = min(B, 8)           # amortize per-grid-step overhead
    pad = (-B) % b_blk
    if pad:
        x_ble = jnp.pad(x_ble, ((0, pad), (0, 0), (0, 0)))
    out = x_ble.astype(jnp.float32)
    for lp in layers_params:        # num_layers stacked clones, post-norm
        out = _encoder_layer_ble(out, _prep_layer(lp), b_blk)
    if pad:
        out = out[:B]
    return out
    # TODO(synk): optional final `norm` of nn.TransformerEncoder is None here.


def transformer_encoder(src_lbe, layers_params):
    """nn.TransformerEncoder-compatible entry point: src is (L, B, E)."""
    x = jnp.transpose(src_lbe, (1, 0, 2))
    y = transformer_encoder_ble(x, layers_params)
    return jnp.transpose(y, (1, 0, 2))


def pointnet_sa_module_forward(xyz, features, layers_params):
    """
    Mirrors _PointnetSAModuleBase.forward for the base configuration:
      xyz:      (B, N, 3)
      features: (B, N, C=128)
    returns (new_xyz, new_features) with new_features (B, 128, npoint).

    The PyTorch path does (B,N,C)->(B,C,N)->(N,B,C)->encoder->(B,C,N); the two
    input permutes cancel against the encoder's internal batch-first layout,
    so we feed (B, N, C) straight to the kernel and keep a single final
    transpose.
    """
    # TODO(synk): furthest_point_sample / gather_operation / ball-query groupers
    # are external CUDA ops (pointnet2_utils) and undefined (None) in this base class.
    new_xyz = None
    out_ble = transformer_encoder_ble(features, layers_params)      # (B, N, C)
    new_features = jnp.transpose(out_ble, (0, 2, 1))                 # (B, C, npoint)
    return new_xyz, new_features


def init_layer_params(key):
    ks = jax.random.split(key, 8)
    s = 0.05
    return {
        "in_proj_w": s * jax.random.normal(ks[0], (3 * D_MODEL, D_MODEL), jnp.float32),
        "in_proj_b": s * jax.random.normal(ks[1], (3 * D_MODEL,), jnp.float32),
        "out_proj_w": s * jax.random.normal(ks[2], (D_MODEL, D_MODEL), jnp.float32),
        "out_proj_b": s * jax.random.normal(ks[3], (D_MODEL,), jnp.float32),
        "norm1_w": jnp.ones((D_MODEL,), jnp.float32),
        "norm1_b": jnp.zeros((D_MODEL,), jnp.float32),
        "lin1_w": s * jax.random.normal(ks[4], (D_FF, D_MODEL), jnp.float32),
        "lin1_b": s * jax.random.normal(ks[5], (D_FF,), jnp.float32),
        "lin2_w": s * jax.random.normal(ks[6], (D_MODEL, D_FF), jnp.float32),
        "lin2_b": s * jax.random.normal(ks[7], (D_MODEL,), jnp.float32),
        "norm2_w": jnp.ones((D_MODEL,), jnp.float32),
        "norm2_b": jnp.zeros((D_MODEL,), jnp.float32),
    }


if __name__ == "__main__":
    key = jax.random.PRNGKey(0)
    k_xyz, k_feat, k_l0, k_l1 = jax.random.split(key, 4)

    B, N = 2, 8                     # batch=2, npoint(seq)=8, d_model=128
    NUM_LAYERS = 2
    xyz = jax.random.normal(k_xyz, (B, N, 3), jnp.float32)
    features = jax.random.normal(k_feat, (B, N, D_MODEL), jnp.float32)
    layers_params = [init_layer_params(k) for k in (k_l0, k_l1)][:NUM_LAYERS]

    new_xyz, new_features = pointnet_sa_module_forward(xyz, features, layers_params)
    new_features = jax.block_until_ready(new_features)

    assert new_features.shape == (B, D_MODEL, N)
    assert bool(jnp.all(jnp.isfinite(new_features)))
    print("KERNEL_OK")
</pallas_src>

<mosaic_0001>
module attributes {stable_mosaic.version = 11 : i64} {
  func.func @encoder_layer_kernel(%arg0: i32, %arg1: memref<2x8x128xf32, #tpu.memory_space<vmem>>, %arg2: memref<128x384xbf16, #tpu.memory_space<vmem>>, %arg3: memref<1x384xf32, #tpu.memory_space<vmem>>, %arg4: memref<128x128xbf16, #tpu.memory_space<vmem>>, %arg5: memref<1x128xf32, #tpu.memory_space<vmem>>, %arg6: memref<1x128xf32, #tpu.memory_space<vmem>>, %arg7: memref<1x128xf32, #tpu.memory_space<vmem>>, %arg8: memref<128x128xbf16, #tpu.memory_space<vmem>>, %arg9: memref<1x128xf32, #tpu.memory_space<vmem>>, %arg10: memref<128x128xbf16, #tpu.memory_space<vmem>>, %arg11: memref<1x128xf32, #tpu.memory_space<vmem>>, %arg12: memref<1x128xf32, #tpu.memory_space<vmem>>, %arg13: memref<1x128xf32, #tpu.memory_space<vmem>>, %arg14: memref<2x8x128xf32, #tpu.memory_space<vmem>>) attributes {dimension_semantics = [#tpu.dimension_semantics<parallel>], iteration_bounds = array<i64: 1>, scalar_prefetch = 0 : i64, scratch_operands = 0 : i64, tpu.core_type = #tpu.core_type<tc>, window_params = [{transform_indices = @transform_0, window_bounds = array<i64: 2, 8, 128>}, {pipeline_mode = #tpu.pipeline_mode<synchronous>, transform_indices = @transform_1, window_bounds = array<i64: 128, 384>}, {pipeline_mode = #tpu.pipeline_mode<synchronous>, transform_indices = @transform_2, window_bounds = array<i64: 1, 384>}, {pipeline_mode = #tpu.pipeline_mode<synchronous>, transform_indices = @transform_3, window_bounds = array<i64: 128, 128>}, {pipeline_mode = #tpu.pipeline_mode<synchronous>, transform_indices = @transform_4, window_bounds = array<i64: 1, 128>}, {pipeline_mode = #tpu.pipeline_mode<synchronous>, transform_indices = @transform_5, window_bounds = array<i64: 1, 128>}, {pipeline_mode = #tpu.pipeline_mode<synchronous>, transform_indices = @transform_6, window_bounds = array<i64: 1, 128>}, {pipeline_mode = #tpu.pipeline_mode<synchronous>, transform_indices = @transform_7, window_bounds = array<i64: 128, 128>}, {pipeline_mode = #tpu.pipeline_mode<synchronous>, transform_indices = @transform_8, window_bounds = array<i64: 1, 128>}, {pipeline_mode = #tpu.pipeline_mode<synchronous>, transform_indices = @transform_9, window_bounds = array<i64: 128, 128>}, {pipeline_mode = #tpu.pipeline_mode<synchronous>, transform_indices = @transform_10, window_bounds = array<i64: 1, 128>}, {pipeline_mode = #tpu.pipeline_mode<synchronous>, transform_indices = @transform_11, window_bounds = array<i64: 1, 128>}, {pipeline_mode = #tpu.pipeline_mode<synchronous>, transform_indices = @transform_12, window_bounds = array<i64: 1, 128>}, {transform_indices = @transform_13, window_bounds = array<i64: 2, 8, 128>}]} {
    %c0 = arith.constant 0 : index
    %c0_0 = arith.constant 0 : index
    %c0_1 = arith.constant 0 : index
    %0 = vector.load %arg1[%c0, %c0_0, %c0_1] : memref<2x8x128xf32, #tpu.memory_space<vmem>>, vector<2x8x128xf32>
    %1 = vector.shape_cast %0 : vector<2x8x128xf32> to vector<16x128xf32>
    %2 = arith.truncf %1 : vector<16x128xf32> to vector<16x128xbf16>
    %c0_2 = arith.constant 0 : index
    %c0_3 = arith.constant 0 : index
    %3 = vector.load %arg2[%c0_2, %c0_3] : memref<128x384xbf16, #tpu.memory_space<vmem>>, vector<128x384xbf16>
    %cst = arith.constant dense<0.000000e+00> : vector<16x384xf32>
    %4 = tpu.matmul %2, %3, %cst {dimension_numbers = #tpu.dot_dimension_numbers<[1], [0], [0], [1], [0, 0, 1, 1], [], []>} : vector<16x128xbf16>, vector<128x384xbf16>, vector<16x384xf32> -> vector<16x384xf32>
    %c0_4 = arith.constant 0 : index
    %c0_5 = arith.constant 0 : index
    %5 = vector.load %arg3[%c0_4, %c0_5] : memref<1x384xf32, #tpu.memory_space<vmem>>, vector<1x384xf32>
    %6 = vector.broadcast %5 : vector<1x384xf32> to vector<16x384xf32>
    %7 = arith.addf %4, %6 : vector<16x384xf32>
    %c0_6 = arith.constant 0 : index
    %c0_7 = arith.constant 0 : index
    %8 = vector.load %arg4[%c0_6, %c0_7] : memref<128x128xbf16, #tpu.memory_space<vmem>>, vector<128x128xbf16>
    %9 = vector.extract_strided_slice %7 {offsets = [0, 0], sizes = [8, 128], strides = [1, 1]} : vector<16x384xf32> to vector<8x128xf32>
    %10 = vector.extract_strided_slice %7 {offsets = [0, 128], sizes = [8, 128], strides = [1, 1]} : vector<16x384xf32> to vector<8x128xf32>
    %11 = vector.extract_strided_slice %7 {offsets = [0, 256], sizes = [8, 128], strides = [1, 1]} : vector<16x384xf32> to vector<8x128xf32>
    %cst_8 = arith.constant 0.000000e+00 : f32
    %12 = vector.broadcast %cst_8 : f32 to vector<8x128xf32>
    %13 = vector.extract_strided_slice %9 {offsets = [0, 0], sizes = [8, 32], strides = [1, 1]} : vector<8x128xf32> to vector<8x32xf32>
    %14 = arith.truncf %13 : vector<8x32xf32> to vector<8x32xbf16>
    %15 = vector.extract_strided_slice %10 {offsets = [0, 0], sizes = [8, 32], strides = [1, 1]} : vector<8x128xf32> to vector<8x32xf32>
    %16 = arith.truncf %15 : vector<8x32xf32> to vector<8x32xbf16>
    %17 = vector.extract_strided_slice %11 {offsets = [0, 0], sizes = [8, 32], strides = [1, 1]} : vector<8x128xf32> to vector<8x32xf32>
    %18 = arith.truncf %17 : vector<8x32xf32> to vector<8x32xbf16>
    %cst_9 = arith.constant dense<0.000000e+00> : vector<8x8xf32>
    %19 = tpu.matmul %14, %16, %cst_9 {dimension_numbers = #tpu.dot_dimension_numbers<[1], [1], [0], [0], [0, 0, 1, 0], [], []>} : vector<8x32xbf16>, vector<8x32xbf16>, vector<8x8xf32> -> vector<8x8xf32>
    %cst_10 = arith.constant dense<0xFF800000> : vector<8xf32>
    %20 = vector.multi_reduction <maximumf>, %19, %cst_10 [1] : vector<8x8xf32> to vector<8xf32>
    %21 = vector.shape_cast %20 : vector<8xf32> to vector<8x1xf32>
    %22 = vector.broadcast %21 : vector<8x1xf32> to vector<8x8xf32>
    %23 = arith.subf %19, %22 : vector<8x8xf32>
    %24 = math.exp %23 : vector<8x8xf32>
    %cst_11 = arith.constant dense<0.000000e+00> : vector<8xf32>
    %25 = vector.multi_reduction <add>, %24, %cst_11 [1] : vector<8x8xf32> to vector<8xf32>
    %26 = vector.shape_cast %25 : vector<8xf32> to vector<8x1xf32>
    %27 = tpu.reciprocal %26 {approx = true} : vector<8x1xf32> -> vector<8x1xf32>
    %28 = vector.broadcast %27 : vector<8x1xf32> to vector<8x8xf32>
    %29 = arith.mulf %24, %28 : vector<8x8xf32>
    %30 = arith.truncf %29 : vector<8x8xf32> to vector<8x8xbf16>
    %cst_12 = arith.constant dense<0.000000e+00> : vector<8x32xf32>
    %31 = tpu.matmul %30, %18, %cst_12 {dimension_numbers = #tpu.dot_dimension_numbers<[1], [0], [0], [1], [0, 0, 1, 1], [], []>} : vector<8x8xbf16>, vector<8x32xbf16>, vector<8x32xf32> -> vector<8x32xf32>
    %32 = arith.truncf %31 : vector<8x32xf32> to vector<8x32xbf16>
    %33 = vector.extract_strided_slice %8 {offsets = [0, 0], sizes = [32, 128], strides = [1, 1]} : vector<128x128xbf16> to vector<32x128xbf16>
    %cst_13 = arith.constant dense<0.000000e+00> : vector<8x128xf32>
    %34 = tpu.matmul %32, %33, %cst_13 {dimension_numbers = #tpu.dot_dimension_numbers<[1], [0], [0], [1], [0, 0, 1, 1], [], []>} : vector<8x32xbf16>, vector<32x128xbf16>, vector<8x128xf32> -> vector<8x128xf32>
    %35 = arith.addf %12, %34 : vector<8x128xf32>
    %36 = vector.extract_strided_slice %9 {offsets = [0, 32], sizes = [8, 32], strides = [1, 1]} : vector<8x128xf32> to vector<8x32xf32>
    %37 = arith.truncf %36 : vector<8x32xf32> to vector<8x32xbf16>
    %38 = vector.extract_strided_slice %10 {offsets = [0, 32], sizes = [8, 32], strides = [1, 1]} : vector<8x128xf32> to vector<8x32xf32>
    %39 = arith.truncf %38 : vector<8x32xf32> to vector<8x32xbf16>
    %40 = vector.extract_strided_slice %11 {offsets = [0, 32], sizes = [8, 32], strides = [1, 1]} : vector<8x128xf32> to vector<8x32xf32>
    %41 = arith.truncf %40 : vector<8x32xf32> to vector<8x32xbf16>
    %cst_14 = arith.constant dense<0.000000e+00> : vector<8x8xf32>
    %42 = tpu.matmul %37, %39, %cst_14 {dimension_numbers = #tpu.dot_dimension_numbers<[1], [1], [0], [0], [0, 0, 1, 0], [], []>} : vector<8x32xbf16>, vector<8x32xbf16>, vector<8x8xf32> -> vector<8x8xf32>
    %cst_15 = arith.constant dense<0xFF800000> : vector<8xf32>
    %43 = vector.multi_reduction <maximumf>, %42, %cst_15 [1] : vector<8x8xf32> to vector<8xf32>
    %44 = vector.shape_cast %43 : vector<8xf32> to vector<8x1xf32>
    %45 = vector.broadcast %44 : vector<8x1xf32> to vector<8x8xf32>
    %46 = arith.subf %42, %45 : vector<8x8xf32>
    %47 = math.exp %46 : vector<8x8xf32>
    %cst_16 = arith.constant dense<0.000000e+00> : vector<8xf32>
    %48 = vector.multi_reduction <add>, %47, %cst_16 [1] : vector<8x8xf32> to vector<8xf32>
    %49 = vector.shape_cast %48 : vector<8xf32> to vector<8x1xf32>
    %50 = tpu.reciprocal %49 {approx = true} : vector<8x1xf32> -> vector<8x1xf32>
    %51 = vector.broadcast %50 : vector<8x1xf32> to vector<8x8xf32>
    %52 = arith.mulf %47, %51 : vector<8x8xf32>
    %53 = arith.truncf %52 : vector<8x8xf32> to vector<8x8xbf16>
    %cst_17 = arith.constant dense<0.000000e+00> : vector<8x32xf32>
    %54 = tpu.matmul %53, %41, %cst_17 {dimension_numbers = #tpu.dot_dimension_numbers<[1], [0], [0], [1], [0, 0, 1, 1], [], []>} : vector<8x8xbf16>, vector<8x32xbf16>, vector<8x32xf32> -> vector<8x32xf32>
    %55 = arith.truncf %54 : vector<8x32xf32> to vector<8x32xbf16>
    %56 = vector.extract_strided_slice %8 {offsets = [32, 0], sizes = [32, 128], strides = [1, 1]} : vector<128x128xbf16> to vector<32x128xbf16>
    %cst_18 = arith.constant dense<0.000000e+00> : vector<8x128xf32>
    %57 = tpu.matmul %55, %56, %cst_18 {dimension_numbers = #tpu.dot_dimension_numbers<[1], [0], [0], [1], [0, 0, 1, 1], [], []>} : vector<8x32xbf16>, vector<32x128xbf16>, vector<8x128xf32> -> vector<8x128xf32>
    %58 = arith.addf %35, %57 : vector<8x128xf32>
    %59 = vector.extract_strided_slice %9 {offsets = [0, 64], sizes = [8, 32], strides = [1, 1]} : vector<8x128xf32> to vector<8x32xf32>
    %60 = arith.truncf %59 : vector<8x32xf32> to vector<8x32xbf16>
    %61 = vector.extract_strided_slice %10 {offsets = [0, 64], sizes = [8, 32], strides = [1, 1]} : vector<8x128xf32> to vector<8x32xf32>
    %62 = arith.truncf %61 : vector<8x32xf32> to vector<8x32xbf16>
    %63 = vector.extract_strided_slice %11 {offsets = [0, 64], sizes = [8, 32], strides = [1, 1]} : vector<8x128xf32> to vector<8x32xf32>
    %64 = arith.truncf %63 : vector<8x32xf32> to vector<8x32xbf16>
    %cst_19 = arith.constant dense<0.000000e+00> : vector<8x8xf32>
    %65 = tpu.matmul %60, %62, %cst_19 {dimension_numbers = #tpu.dot_dimension_numbers<[1], [1], [0], [0], [0, 0, 1, 0], [], []>} : vector<8x32xbf16>, vector<8x32xbf16>, vector<8x8xf32> -> vector<8x8xf32>
    %cst_20 = arith.constant dense<0xFF800000> : vector<8xf32>
    %66 = vector.multi_reduction <maximumf>, %65, %cst_20 [1] : vector<8x8xf32> to vector<8xf32>
    %67 = vector.shape_cast %66 : vector<8xf32> to vector<8x1xf32>
    %68 = vector.broadcast %67 : vector<8x1xf32> to vector<8x8xf32>
    %69 = arith.subf %65, %68 : vector<8x8xf32>
    %70 = math.exp %69 : vector<8x8xf32>
    %cst_21 = arith.constant dense<0.000000e+00> : vector<8xf32>
    %71 = vector.multi_reduction <add>, %70, %cst_21 [1] : vector<8x8xf32> to vector<8xf32>
    %72 = vector.shape_cast %71 : vector<8xf32> to vector<8x1xf32>
    %73 = tpu.reciprocal %72 {approx = true} : vector<8x1xf32> -> vector<8x1xf32>
    %74 = vector.broadcast %73 : vector<8x1xf32> to vector<8x8xf32>
    %75 = arith.mulf %70, %74 : vector<8x8xf32>
    %76 = arith.truncf %75 : vector<8x8xf32> to vector<8x8xbf16>
    %cst_22 = arith.constant dense<0.000000e+00> : vector<8x32xf32>
    %77 = tpu.matmul %76, %64, %cst_22 {dimension_numbers = #tpu.dot_dimension_numbers<[1], [0], [0], [1], [0, 0, 1, 1], [], []>} : vector<8x8xbf16>, vector<8x32xbf16>, vector<8x32xf32> -> vector<8x32xf32>
    %78 = arith.truncf %77 : vector<8x32xf32> to vector<8x32xbf16>
    %79 = vector.extract_strided_slice %8 {offsets = [64, 0], sizes = [32, 128], strides = [1, 1]} : vector<128x128xbf16> to vector<32x128xbf16>
    %cst_23 = arith.constant dense<0.000000e+00> : vector<8x128xf32>
    %80 = tpu.matmul %78, %79, %cst_23 {dimension_numbers = #tpu.dot_dimension_numbers<[1], [0], [0], [1], [0, 0, 1, 1], [], []>} : vector<8x32xbf16>, vector<32x128xbf16>, vector<8x128xf32> -> vector<8x128xf32>
    %81 = arith.addf %58, %80 : vector<8x128xf32>
    %82 = vector.extract_strided_slice %9 {offsets = [0, 96], sizes = [8, 32], strides = [1, 1]} : vector<8x128xf32> to vector<8x32xf32>
    %83 = arith.truncf %82 : vector<8x32xf32> to vector<8x32xbf16>
    %84 = vector.extract_strided_slice %10 {offsets = [0, 96], sizes = [8, 32], strides = [1, 1]} : vector<8x128xf32> to vector<8x32xf32>
    %85 = arith.truncf %84 : vector<8x32xf32> to vector<8x32xbf16>
    %86 = vector.extract_strided_slice %11 {offsets = [0, 96], sizes = [8, 32], strides = [1, 1]} : vector<8x128xf32> to vector<8x32xf32>
    %87 = arith.truncf %86 : vector<8x32xf32> to vector<8x32xbf16>
    %cst_24 = arith.constant dense<0.000000e+00> : vector<8x8xf32>
    %88 = tpu.matmul %83, %85, %cst_24 {dimension_numbers = #tpu.dot_dimension_numbers<[1], [1], [0], [0], [0, 0, 1, 0], [], []>} : vector<8x32xbf16>, vector<8x32xbf16>, vector<8x8xf32> -> vector<8x8xf32>
    %cst_25 = arith.constant dense<0xFF800000> : vector<8xf32>
    %89 = vector.multi_reduction <maximumf>, %88, %cst_25 [1] : vector<8x8xf32> to vector<8xf32>
    %90 = vector.shape_cast %89 : vector<8xf32> to vector<8x1xf32>
    %91 = vector.broadcast %90 : vector<8x1xf32> to vector<8x8xf32>
    %92 = arith.subf %88, %91 : vector<8x8xf32>
    %93 = math.exp %92 : vector<8x8xf32>
    %cst_26 = arith.constant dense<0.000000e+00> : vector<8xf32>
    %94 = vector.multi_reduction <add>, %93, %cst_26 [1] : vector<8x8xf32> to vector<8xf32>
    %95 = vector.shape_cast %94 : vector<8xf32> to vector<8x1xf32>
    %96 = tpu.reciprocal %95 {approx = true} : vector<8x1xf32> -> vector<8x1xf32>
    %97 = vector.broadcast %96 : vector<8x1xf32> to vector<8x8xf32>
    %98 = arith.mulf %93, %97 : vector<8x8xf32>
    %99 = arith.truncf %98 : vector<8x8xf32> to vector<8x8xbf16>
    %cst_27 = arith.constant dense<0.000000e+00> : vector<8x32xf32>
    %100 = tpu.matmul %99, %87, %cst_27 {dimension_numbers = #tpu.dot_dimension_numbers<[1], [0], [0], [1], [0, 0, 1, 1], [], []>} : vector<8x8xbf16>, vector<8x32xbf16>, vector<8x32xf32> -> vector<8x32xf32>
    %101 = arith.truncf %100 : vector<8x32xf32> to vector<8x32xbf16>
    %102 = vector.extract_strided_slice %8 {offsets = [96, 0], sizes = [32, 128], strides = [1, 1]} : vector<128x128xbf16> to vector<32x128xbf16>
    %cst_28 = arith.constant dense<0.000000e+00> : vector<8x128xf32>
    %103 = tpu.matmul %101, %102, %cst_28 {dimension_numbers = #tpu.dot_dimension_numbers<[1], [0], [0], [1], [0, 0, 1, 1], [], []>} : vector<8x32xbf16>, vector<32x128xbf16>, vector<8x128xf32> -> vector<8x128xf32>
    %104 = arith.addf %81, %103 : vector<8x128xf32>
    %105 = vector.extract_strided_slice %7 {offsets = [8, 0], sizes = [8, 128], strides = [1, 1]} : vector<16x384xf32> to vector<8x128xf32>
    %106 = vector.extract_strided_slice %7 {offsets = [8, 128], sizes = [8, 128], strides = [1, 1]} : vector<16x384xf32> to vector<8x128xf32>
    %107 = vector.extract_strided_slice %7 {offsets = [8, 256], sizes = [8, 128], strides = [1, 1]} : vector<16x384xf32> to vector<8x128xf32>
    %cst_29 = arith.constant 0.000000e+00 : f32
    %108 = vector.broadcast %cst_29 : f32 to vector<8x128xf32>
    %109 = vector.extract_strided_slice %105 {offsets = [0, 0], sizes = [8, 32], strides = [1, 1]} : vector<8x128xf32> to vector<8x32xf32>
    %110 = arith.truncf %109 : vector<8x32xf32> to vector<8x32xbf16>
    %111 = vector.extract_strided_slice %106 {offsets = [0, 0], sizes = [8, 32], strides = [1, 1]} : vector<8x128xf32> to vector<8x32xf32>
    %112 = arith.truncf %111 : vector<8x32xf32> to vector<8x32xbf16>
    %113 = vector.extract_strided_slice %107 {offsets = [0, 0], sizes = [8, 32], strides = [1, 1]} : vector<8x128xf32> to vector<8x32xf32>
    %114 = arith.truncf %113 : vector<8x32xf32> to vector<8x32xbf16>
    %cst_30 = arith.constant dense<0.000000e+00> : vector<8x8xf32>
    %115 = tpu.matmul %110, %112, %cst_30 {dimension_numbers = #tpu.dot_dimension_numbers<[1], [1], [0], [0], [0, 0, 1, 0], [], []>} : vector<8x32xbf16>, vector<8x32xbf16>, vector<8x8xf32> -> vector<8x8xf32>
    %cst_31 = arith.constant dense<0xFF800000> : vector<8xf32>
    %116 = vector.multi_reduction <maximumf>, %115, %cst_31 [1] : vector<8x8xf32> to vector<8xf32>
    %117 = vector.shape_cast %116 : vector<8xf32> to vector<8x1xf32>
    %118 = vector.broadcast %117 : vector<8x1xf32> to vector<8x8xf32>
    %119 = arith.subf %115, %118 : vector<8x8xf32>
    %120 = math.exp %119 : vector<8x8xf32>
    %cst_32 = arith.constant dense<0.000000e+00> : vector<8xf32>
    %121 = vector.multi_reduction <add>, %120, %cst_32 [1] : vector<8x8xf32> to vector<8xf32>
    %122 = vector.shape_cast %121 : vector<8xf32> to vector<8x1xf32>
    %123 = tpu.reciprocal %122 {approx = true} : vector<8x1xf32> -> vector<8x1xf32>
    %124 = vector.broadcast %123 : vector<8x1xf32> to vector<8x8xf32>
    %125 = arith.mulf %120, %124 : vector<8x8xf32>
    %126 = arith.truncf %125 : vector<8x8xf32> to vector<8x8xbf16>
    %cst_33 = arith.constant dense<0.000000e+00> : vector<8x32xf32>
    %127 = tpu.matmul %126, %114, %cst_33 {dimension_numbers = #tpu.dot_dimension_numbers<[1], [0], [0], [1], [0, 0, 1, 1], [], []>} : vector<8x8xbf16>, vector<8x32xbf16>, vector<8x32xf32> -> vector<8x32xf32>
    %128 = arith.truncf %127 : vector<8x32xf32> to vector<8x32xbf16>
    %129 = vector.extract_strided_slice %8 {offsets = [0, 0], sizes = [32, 128], strides = [1, 1]} : vector<128x128xbf16> to vector<32x128xbf16>
    %cst_34 = arith.constant dense<0.000000e+00> : vector<8x128xf32>
    %130 = tpu.matmul %128, %129, %cst_34 {dimension_numbers = #tpu.dot_dimension_numbers<[1], [0], [0], [1], [0, 0, 1, 1], [], []>} : vector<8x32xbf16>, vector<32x128xbf16>, vector<8x128xf32> -> vector<8x128xf32>
    %131 = arith.addf %108, %130 : vector<8x128xf32>
    %132 = vector.extract_strided_slice %105 {offsets = [0, 32], sizes = [8, 32], strides = [1, 1]} : vector<8x128xf32> to vector<8x32xf32>
    %133 = arith.truncf %132 : vector<8x32xf32> to vector<8x32xbf16>
    %134 = vector.extract_strided_slice %106 {offsets = [0, 32], sizes = [8, 32], strides = [1, 1]} : vector<8x128xf32> to vector<8x32xf32>
    %135 = arith.truncf %134 : vector<8x32xf32> to vector<8x32xbf16>
    %136 = vector.extract_strided_slice %107 {offsets = [0, 32], sizes = [8, 32], strides = [1, 1]} : vector<8x128xf32> to vector<8x32xf32>
    %137 = arith.truncf %136 : vector<8x32xf32> to vector<8x32xbf16>
    %cst_35 = arith.constant dense<0.000000e+00> : vector<8x8xf32>
    %138 = tpu.matmul %133, %135, %cst_35 {dimension_numbers = #tpu.dot_dimension_numbers<[1], [1], [0], [0], [0, 0, 1, 0], [], []>} : vector<8x32xbf16>, vector<8x32xbf16>, vector<8x8xf32> -> vector<8x8xf32>
    %cst_36 = arith.constant dense<0xFF800000> : vector<8xf32>
    %139 = vector.multi_reduction <maximumf>, %138, %cst_36 [1] : vector<8x8xf32> to vector<8xf32>
    %140 = vector.shape_cast %139 : vector<8xf32> to vector<8x1xf32>
    %141 = vector.broadcast %140 : vector<8x1xf32> to vector<8x8xf32>
    %142 = arith.subf %138, %141 : vector<8x8xf32>
    %143 = math.exp %142 : vector<8x8xf32>
    %cst_37 = arith.constant dense<0.000000e+00> : vector<8xf32>
    %144 = vector.multi_reduction <add>, %143, %cst_37 [1] : vector<8x8xf32> to vector<8xf32>
    %145 = vector.shape_cast %144 : vector<8xf32> to vector<8x1xf32>
    %146 = tpu.reciprocal %145 {approx = true} : vector<8x1xf32> -> vector<8x1xf32>
    %147 = vector.broadcast %146 : vector<8x1xf32> to vector<8x8xf32>
    %148 = arith.mulf %143, %147 : vector<8x8xf32>
    %149 = arith.truncf %148 : vector<8x8xf32> to vector<8x8xbf16>
    %cst_38 = arith.constant dense<0.000000e+00> : vector<8x32xf32>
    %150 = tpu.matmul %149, %137, %cst_38 {dimension_numbers = #tpu.dot_dimension_numbers<[1], [0], [0], [1], [0, 0, 1, 1], [], []>} : vector<8x8xbf16>, vector<8x32xbf16>, vector<8x32xf32> -> vector<8x32xf32>
    %151 = arith.truncf %150 : vector<8x32xf32> to vector<8x32xbf16>
    %152 = vector.extract_strided_slice %8 {offsets = [32, 0], sizes = [32, 128], strides = [1, 1]} : vector<128x128xbf16> to vector<32x128xbf16>
    %cst_39 = arith.constant dense<0.000000e+00> : vector<8x128xf32>
    %153 = tpu.matmul %151, %152, %cst_39 {dimension_numbers = #tpu.dot_dimension_numbers<[1], [0], [0], [1], [0, 0, 1, 1], [], []>} : vector<8x32xbf16>, vector<32x128xbf16>, vector<8x128xf32> -> vector<8x128xf32>
    %154 = arith.addf %131, %153 : vector<8x128xf32>
    %155 = vector.extract_strided_slice %105 {offsets = [0, 64], sizes = [8, 32], strides = [1, 1]} : vector<8x128xf32> to vector<8x32xf32>
    %156 = arith.truncf %155 : vector<8x32xf32> to vector<8x32xbf16>
    %157 = vector.extract_strided_slice %106 {offsets = [0, 64], sizes = [8, 32], strides = [1, 1]} : vector<8x128xf32> to vector<8x32xf32>
    %158 = arith.truncf %157 : vector<8x32xf32> to vector<8x32xbf16>
    %159 = vector.extract_strided_slice %107 {offsets = [0, 64], sizes = [8, 32], strides = [1, 1]} : vector<8x128xf32> to vector<8x32xf32>
    %160 = arith.truncf %159 : vector<8x32xf32> to vector<8x32xbf16>
    %cst_40 = arith.constant dense<0.000000e+00> : vector<8x8xf32>
    %161 = tpu.matmul %156, %158, %cst_40 {dimension_numbers = #tpu.dot_dimension_numbers<[1], [1], [0], [0], [0, 0, 1, 0], [], []>} : vector<8x32xbf16>, vector<8x32xbf16>, vector<8x8xf32> -> vector<8x8xf32>
    %cst_41 = arith.constant dense<0xFF800000> : vector<8xf32>
    %162 = vector.multi_reduction <maximumf>, %161, %cst_41 [1] : vector<8x8xf32> to vector<8xf32>
    %163 = vector.shape_cast %162 : vector<8xf32> to vector<8x1xf32>
    %164 = vector.broadcast %163 : vector<8x1xf32> to vector<8x8xf32>
    %165 = arith.subf %161, %164 : vector<8x8xf32>
    %166 = math.exp %165 : vector<8x8xf32>
    %cst_42 = arith.constant dense<0.000000e+00> : vector<8xf32>
    %167 = vector.multi_reduction <add>, %166, %cst_42 [1] : vector<8x8xf32> to vector<8xf32>
    %168 = vector.shape_cast %167 : vector<8xf32> to vector<8x1xf32>
    %169 = tpu.reciprocal %168 {approx = true} : vector<8x1xf32> -> vector<8x1xf32>
    %170 = vector.broadcast %169 : vector<8x1xf32> to vector<8x8xf32>
    %171 = arith.mulf %166, %170 : vector<8x8xf32>
    %172 = arith.truncf %171 : vector<8x8xf32> to vector<8x8xbf16>
    %cst_43 = arith.constant dense<0.000000e+00> : vector<8x32xf32>
    %173 = tpu.matmul %172, %160, %cst_43 {dimension_numbers = #tpu.dot_dimension_numbers<[1], [0], [0], [1], [0, 0, 1, 1], [], []>} : vector<8x8xbf16>, vector<8x32xbf16>, vector<8x32xf32> -> vector<8x32xf32>
    %174 = arith.truncf %173 : vector<8x32xf32> to vector<8x32xbf16>
    %175 = vector.extract_strided_slice %8 {offsets = [64, 0], sizes = [32, 128], strides = [1, 1]} : vector<128x128xbf16> to vector<32x128xbf16>
    %cst_44 = arith.constant dense<0.000000e+00> : vector<8x128xf32>
    %176 = tpu.matmul %174, %175, %cst_44 {dimension_numbers = #tpu.dot_dimension_numbers<[1], [0], [0], [1], [0, 0, 1, 1], [], []>} : vector<8x32xbf16>, vector<32x128xbf16>, vector<8x128xf32> -> vector<8x128xf32>
    %177 = arith.addf %154, %176 : vector<8x128xf32>
    %178 = vector.extract_strided_slice %105 {offsets = [0, 96], sizes = [8, 32], strides = [1, 1]} : vector<8x128xf32> to vector<8x32xf32>
    %179 = arith.truncf %178 : vector<8x32xf32> to vector<8x32xbf16>
    %180 = vector.extract_strided_slice %106 {offsets = [0, 96], sizes = [8, 32], strides = [1, 1]} : vector<8x128xf32> to vector<8x32xf32>
    %181 = arith.truncf %180 : vector<8x32xf32> to vector<8x32xbf16>
    %182 = vector.extract_strided_slice %107 {offsets = [0, 96], sizes = [8, 32], strides = [1, 1]} : vector<8x128xf32> to vector<8x32xf32>
    %183 = arith.truncf %182 : vector<8x32xf32> to vector<8x32xbf16>
    %cst_45 = arith.constant dense<0.000000e+00> : vector<8x8xf32>
    %184 = tpu.matmul %179, %181, %cst_45 {dimension_numbers = #tpu.dot_dimension_numbers<[1], [1], [0], [0], [0, 0, 1, 0], [], []>} : vector<8x32xbf16>, vector<8x32xbf16>, vector<8x8xf32> -> vector<8x8xf32>
    %cst_46 = arith.constant dense<0xFF800000> : vector<8xf32>
    %185 = vector.multi_reduction <maximumf>, %184, %cst_46 [1] : vector<8x8xf32> to vector<8xf32>
    %186 = vector.shape_cast %185 : vector<8xf32> to vector<8x1xf32>
    %187 = vector.broadcast %186 : vector<8x1xf32> to vector<8x8xf32>
    %188 = arith.subf %184, %187 : vector<8x8xf32>
    %189 = math.exp %188 : vector<8x8xf32>
    %cst_47 = arith.constant dense<0.000000e+00> : vector<8xf32>
    %190 = vector.multi_reduction <add>, %189, %cst_47 [1] : vector<8x8xf32> to vector<8xf32>
    %191 = vector.shape_cast %190 : vector<8xf32> to vector<8x1xf32>
    %192 = tpu.reciprocal %191 {approx = true} : vector<8x1xf32> -> vector<8x1xf32>
    %193 = vector.broadcast %192 : vector<8x1xf32> to vector<8x8xf32>
    %194 = arith.mulf %189, %193 : vector<8x8xf32>
    %195 = arith.truncf %194 : vector<8x8xf32> to vector<8x8xbf16>
    %cst_48 = arith.constant dense<0.000000e+00> : vector<8x32xf32>
    %196 = tpu.matmul %195, %183, %cst_48 {dimension_numbers = #tpu.dot_dimension_numbers<[1], [0], [0], [1], [0, 0, 1, 1], [], []>} : vector<8x8xbf16>, vector<8x32xbf16>, vector<8x32xf32> -> vector<8x32xf32>
    %197 = arith.truncf %196 : vector<8x32xf32> to vector<8x32xbf16>
    %198 = vector.extract_strided_slice %8 {offsets = [96, 0], sizes = [32, 128], strides = [1, 1]} : vector<128x128xbf16> to vector<32x128xbf16>
    %cst_49 = arith.constant dense<0.000000e+00> : vector<8x128xf32>
    %199 = tpu.matmul %197, %198, %cst_49 {dimension_numbers = #tpu.dot_dimension_numbers<[1], [0], [0], [1], [0, 0, 1, 1], [], []>} : vector<8x32xbf16>, vector<32x128xbf16>, vector<8x128xf32> -> vector<8x128xf32>
    %200 = arith.addf %177, %199 : vector<8x128xf32>
    %201 = tpu.concatenate %104, %200 in 0 : vector<8x128xf32>, vector<8x128xf32> -> vector<16x128xf32>
    %c0_50 = arith.constant 0 : index
    %c0_51 = arith.constant 0 : index
    %202 = vector.load %arg5[%c0_50, %c0_51] : memref<1x128xf32, #tpu.memory_space<vmem>>, vector<1x128xf32>
    %203 = vector.broadcast %202 : vector<1x128xf32> to vector<16x128xf32>
    %204 = arith.addf %201, %203 : vector<16x128xf32>
    %205 = arith.addf %1, %204 : vector<16x128xf32>
    %c0_52 = arith.constant 0 : index
    %c0_53 = arith.constant 0 : index
    %206 = vector.load %arg6[%c0_52, %c0_53] : memref<1x128xf32, #tpu.memory_space<vmem>>, vector<1x128xf32>
    %c0_54 = arith.constant 0 : index
    %c0_55 = arith.constant 0 : index
    %207 = vector.load %arg7[%c0_54, %c0_55] : memref<1x128xf32, #tpu.memory_space<vmem>>, vector<1x128xf32>
    %cst_56 = arith.constant dense<0.000000e+00> : vector<16xf32>
    %208 = vector.multi_reduction <add>, %205, %cst_56 [1] : vector<16x128xf32> to vector<16xf32>
    %209 = vector.shape_cast %208 : vector<16xf32> to vector<16x1xf32>
    %cst_57 = arith.constant 1.280000e+02 : f32
    %210 = vector.broadcast %cst_57 : f32 to vector<16x1xf32>
    %211 = arith.divf %209, %210 : vector<16x1xf32>
    %212 = vector.broadcast %211 : vector<16x1xf32> to vector<16x128xf32>
    %213 = arith.subf %205, %212 : vector<16x128xf32>
    %214 = arith.mulf %213, %213 : vector<16x128xf32>
    %cst_58 = arith.constant dense<0.000000e+00> : vector<16xf32>
    %215 = vector.multi_reduction <add>, %214, %cst_58 [1] : vector<16x128xf32> to vector<16xf32>
    %216 = vector.shape_cast %215 : vector<16xf32> to vector<16x1xf32>
    %cst_59 = arith.constant 1.280000e+02 : f32
    %217 = vector.broadcast %cst_59 : f32 to vector<16x1xf32>
    %218 = arith.divf %216, %217 : vector<16x1xf32>
    %cst_60 = arith.constant 9.99999974E-6 : f32
    %219 = vector.broadcast %cst_60 : f32 to vector<16x1xf32>
    %220 = arith.addf %218, %219 : vector<16x1xf32>
    %221 = math.rsqrt %220 : vector<16x1xf32>
    %222 = vector.broadcast %221 : vector<16x1xf32> to vector<16x128xf32>
    %223 = arith.mulf %213, %222 : vector<16x128xf32>
    %224 = vector.broadcast %206 : vector<1x128xf32> to vector<16x128xf32>
    %225 = arith.mulf %223, %224 : vector<16x128xf32>
    %226 = vector.broadcast %207 : vector<1x128xf32> to vector<16x128xf32>
    %227 = arith.addf %225, %226 : vector<16x128xf32>
    %228 = arith.truncf %227 : vector<16x128xf32> to vector<16x128xbf16>
    %c0_61 = arith.constant 0 : index
    %c0_62 = arith.constant 0 : index
    %229 = vector.load %arg8[%c0_61, %c0_62] : memref<128x128xbf16, #tpu.memory_space<vmem>>, vector<128x128xbf16>
    %cst_63 = arith.constant dense<0.000000e+00> : vector<16x128xf32>
    %230 = tpu.matmul %228, %229, %cst_63 {dimension_numbers = #tpu.dot_dimension_numbers<[1], [0], [0], [1], [0, 0, 1, 1], [], []>} : vector<16x128xbf16>, vector<128x128xbf16>, vector<16x128xf32> -> vector<16x128xf32>
    %c0_64 = arith.constant 0 : index
    %c0_65 = arith.constant 0 : index
    %231 = vector.load %arg9[%c0_64, %c0_65] : memref<1x128xf32, #tpu.memory_space<vmem>>, vector<1x128xf32>
    %232 = vector.broadcast %231 : vector<1x128xf32> to vector<16x128xf32>
    %233 = arith.addf %230, %232 : vector<16x128xf32>
    %cst_66 = arith.constant 0.000000e+00 : f32
    %234 = vector.broadcast %cst_66 : f32 to vector<16x128xf32>
    %235 = arith.maximumf %233, %234 : vector<16x128xf32>
    %236 = arith.truncf %235 : vector<16x128xf32> to vector<16x128xbf16>
    %c0_67 = arith.constant 0 : index
    %c0_68 = arith.constant 0 : index
    %237 = vector.load %arg10[%c0_67, %c0_68] : memref<128x128xbf16, #tpu.memory_space<vmem>>, vector<128x128xbf16>
    %cst_69 = arith.constant dense<0.000000e+00> : vector<16x128xf32>
    %238 = tpu.matmul %236, %237, %cst_69 {dimension_numbers = #tpu.dot_dimension_numbers<[1], [0], [0], [1], [0, 0, 1, 1], [], []>} : vector<16x128xbf16>, vector<128x128xbf16>, vector<16x128xf32> -> vector<16x128xf32>
    %c0_70 = arith.constant 0 : index
    %c0_71 = arith.constant 0 : index
    %239 = vector.load %arg11[%c0_70, %c0_71] : memref<1x128xf32, #tpu.memory_space<vmem>>, vector<1x128xf32>
    %240 = vector.broadcast %239 : vector<1x128xf32> to vector<16x128xf32>
    %241 = arith.addf %238, %240 : vector<16x128xf32>
    %242 = arith.addf %227, %241 : vector<16x128xf32>
    %c0_72 = arith.constant 0 : index
    %c0_73 = arith.constant 0 : index
    %243 = vector.load %arg12[%c0_72, %c0_73] : memref<1x128xf32, #tpu.memory_space<vmem>>, vector<1x128xf32>
    %c0_74 = arith.constant 0 : index
    %c0_75 = arith.constant 0 : index
    %244 = vector.load %arg13[%c0_74, %c0_75] : memref<1x128xf32, #tpu.memory_space<vmem>>, vector<1x128xf32>
    %cst_76 = arith.constant dense<0.000000e+00> : vector<16xf32>
    %245 = vector.multi_reduction <add>, %242, %cst_76 [1] : vector<16x128xf32> to vector<16xf32>
    %246 = vector.shape_cast %245 : vector<16xf32> to vector<16x1xf32>
    %cst_77 = arith.constant 1.280000e+02 : f32
    %247 = vector.broadcast %cst_77 : f32 to vector<16x1xf32>
    %248 = arith.divf %246, %247 : vector<16x1xf32>
    %249 = vector.broadcast %248 : vector<16x1xf32> to vector<16x128xf32>
    %250 = arith.subf %242, %249 : vector<16x128xf32>
    %251 = arith.mulf %250, %250 : vector<16x128xf32>
    %cst_78 = arith.constant dense<0.000000e+00> : vector<16xf32>
    %252 = vector.multi_reduction <add>, %251, %cst_78 [1] : vector<16x128xf32> to vector<16xf32>
    %253 = vector.shape_cast %252 : vector<16xf32> to vector<16x1xf32>
    %cst_79 = arith.constant 1.280000e+02 : f32
    %254 = vector.broadcast %cst_79 : f32 to vector<16x1xf32>
    %255 = arith.divf %253, %254 : vector<16x1xf32>
    %cst_80 = arith.constant 9.99999974E-6 : f32
    %256 = vector.broadcast %cst_80 : f32 to vector<16x1xf32>
    %257 = arith.addf %255, %256 : vector<16x1xf32>
    %258 = math.rsqrt %257 : vector<16x1xf32>
    %259 = vector.broadcast %258 : vector<16x1xf32> to vector<16x128xf32>
    %260 = arith.mulf %250, %259 : vector<16x128xf32>
    %261 = vector.broadcast %243 : vector<1x128xf32> to vector<16x128xf32>
    %262 = arith.mulf %260, %261 : vector<16x128xf32>
    %263 = vector.broadcast %244 : vector<1x128xf32> to vector<16x128xf32>
    %264 = arith.addf %262, %263 : vector<16x128xf32>
    %265 = vector.shape_cast %264 : vector<16x128xf32> to vector<2x8x128xf32>
    %c0_81 = arith.constant 0 : index
    %c0_82 = arith.constant 0 : index
    %c0_83 = arith.constant 0 : index
    %266 = vector.load %arg14[%c0_81, %c0_82, %c0_83] : memref<2x8x128xf32, #tpu.memory_space<vmem>>, vector<2x8x128xf32>
    tpu.vector_store %arg14[%c0_81, %c0_82, %c0_83], %265 {strides = array<i32>} : memref<2x8x128xf32, #tpu.memory_space<vmem>>, vector<2x8x128xf32>,
    return
  }
  func.func @transform_0(%arg0: i32) -> (i32, i32, i32) {
    %c0_i32 = arith.constant 0 : i32
    %c0_i32_0 = arith.constant 0 : i32
    %c0_i32_1 = arith.constant 0 : i32
    return %arg0, %c0_i32, %c0_i32_0 : i32, i32, i32
  }
  func.func @transform_1(%arg0: i32) -> (i32, i32) {
    %c0_i32 = arith.constant 0 : i32
    %c0_i32_0 = arith.constant 0 : i32
    %c0_i32_1 = arith.constant 0 : i32
    return %c0_i32, %c0_i32_0 : i32, i32
  }
  func.func @transform_2(%arg0: i32) -> (i32, i32) {
    %c0_i32 = arith.constant 0 : i32
    %c0_i32_0 = arith.constant 0 : i32
    %c0_i32_1 = arith.constant 0 : i32
    return %c0_i32, %c0_i32_0 : i32, i32
  }
  func.func @transform_3(%arg0: i32) -> (i32, i32) {
    %c0_i32 = arith.constant 0 : i32
    %c0_i32_0 = arith.constant 0 : i32
    %c0_i32_1 = arith.constant 0 : i32
    return %c0_i32, %c0_i32_0 : i32, i32
  }
  func.func @transform_4(%arg0: i32) -> (i32, i32) {
    %c0_i32 = arith.constant 0 : i32
    %c0_i32_0 = arith.constant 0 : i32
    %c0_i32_1 = arith.constant 0 : i32
    return %c0_i32, %c0_i32_0 : i32, i32
  }
  func.func @transform_5(%arg0: i32) -> (i32, i32) {
    %c0_i32 = arith.constant 0 : i32
    %c0_i32_0 = arith.constant 0 : i32
    %c0_i32_1 = arith.constant 0 : i32
    return %c0_i32, %c0_i32_0 : i32, i32
  }
  func.func @transform_6(%arg0: i32) -> (i32, i32) {
    %c0_i32 = arith.constant 0 : i32
    %c0_i32_0 = arith.constant 0 : i32
    %c0_i32_1 = arith.constant 0 : i32
    return %c0_i32, %c0_i32_0 : i32, i32
  }
  func.func @transform_7(%arg0: i32) -> (i32, i32) {
    %c0_i32 = arith.constant 0 : i32
    %c0_i32_0 = arith.constant 0 : i32
    %c0_i32_1 = arith.constant 0 : i32
    return %c0_i32, %c0_i32_0 : i32, i32
  }
  func.func @transform_8(%arg0: i32) -> (i32, i32) {
    %c0_i32 = arith.constant 0 : i32
    %c0_i32_0 = arith.constant 0 : i32
    %c0_i32_1 = arith.constant 0 : i32
    return %c0_i32, %c0_i32_0 : i32, i32
  }
  func.func @transform_9(%arg0: i32) -> (i32, i32) {
    %c0_i32 = arith.constant 0 : i32
    %c0_i32_0 = arith.constant 0 : i32
    %c0_i32_1 = arith.constant 0 : i32
    return %c0_i32, %c0_i32_0 : i32, i32
  }
  func.func @transform_10(%arg0: i32) -> (i32, i32) {
    %c0_i32 = arith.constant 0 : i32
    %c0_i32_0 = arith.constant 0 : i32
    %c0_i32_1 = arith.constant 0 : i32
    return %c0_i32, %c0_i32_0 : i32, i32
  }
  func.func @transform_11(%arg0: i32) -> (i32, i32) {
    %c0_i32 = arith.constant 0 : i32
    %c0_i32_0 = arith.constant 0 : i32
    %c0_i32_1 = arith.constant 0 : i32
    return %c0_i32, %c0_i32_0 : i32, i32
  }
  func.func @transform_12(%arg0: i32) -> (i32, i32) {
    %c0_i32 = arith.constant 0 : i32
    %c0_i32_0 = arith.constant 0 : i32
    %c0_i32_1 = arith.constant 0 : i32
    return %c0_i32, %c0_i32_0 : i32, i32
  }
  func.func @transform_13(%arg0: i32) -> (i32, i32, i32) {
    %c0_i32 = arith.constant 0 : i32
    %c0_i32_0 = arith.constant 0 : i32
    %c0_i32_1 = arith.constant 0 : i32
    return %arg0, %c0_i32, %c0_i32_0 : i32, i32, i32
  }
}

</mosaic_0001>

<bundles_post_ra>
// kernel: tpu_custom_call.1
= control target key start
LH: loop header
LB: loop body
LE: loop exit
PB: predicated region body
PF: predicated region fallthrough
CT: control target
= control target key end

     0   :  { %18 = vsyncpa [#allocation3], 0  ;;  %s3160_s0 = inlined_call_operand.hbm [shape: f32[2,8,128], index: 0, kind: input, shape index: {}]   ;;  %s3161_s1 = inlined_call_operand.hbm [shape: bf16[128,384], index: 1, kind: input, shape index: {}]   ;;  %s3162_s2 = inlined_call_operand.vmem [shape: f32[1,384], index: 2, kind: input, shape index: {}]   ;;  %s3163_s3 = inlined_call_operand.hbm [shape: bf16[128,128], index: 3, kind: input, shape index: {}]   ;;  %s3164_s4 = inlined_call_operand.vmem [shape: f32[1,128], index: 4, kind: input, shape index: {}]   ;;  %s3165_s5 = inlined_call_operand.vmem [shape: f32[1,128], index: 5, kind: input, shape index: {}]   ;;  %s3166_s6 = inlined_call_operand.vmem [shape: f32[1,128], index: 6, kind: input, shape index: {}]   ;;  %s3167_s7 = inlined_call_operand.hbm [shape: bf16[128,128], index: 7, kind: input, shape index: {}]   ;;  %s3168_s8 = inlined_call_operand.vmem [shape: f32[1,128], index: 8, kind: input, shape index: {}]   ;;  %s3169_s9 = inlined_call_operand.hbm [shape: bf16[128,128], index: 9, kind: input, shape index: {}]   ;;  %s3170_s10 = inlined_call_operand.vmem [shape: f32[1,128], index: 10, kind: input, shape index: {}]   ;;  %s3171_s11 = inlined_call_operand.vmem [shape: f32[1,128], index: 11, kind: input, shape index: {}]   ;;  %s3172_s12 = inlined_call_operand.vmem [shape: f32[1,128], index: 12, kind: input, shape index: {}]   ;;  %s3173_s13 = inlined_call_operand.hbm [shape: f32[2,8,128], index: 13, kind: output, shape index: {}]  }
   0x1   :  { %19 = vsyncpa [#allocation6], 0 }
   0x2   :  { %20 = vsyncpa [#allocation9], 0 }
   0x3   :  { %21 = vsyncpa [#allocation4], 0  ;;  %s2659_s25 = smov [#allocation5]   ;;  %s2519_s29 = scalar_lea.hbm %s3161_s1, 3072 }
   0x4   :  { %s39_s26 = sshll.u32 %s2659_s25, 4  ;;  %p2520_p0 = scmp.ne.s32.totalorder %s3161_s1, %s2519_s29  ;;  %s40_s26 = int_to_ptr.vmem [resolvable:$true] %s39_s26 }
   0x5   :  { %p2523_p1 = scmp.lt.u32.totalorder %s2519_s29, %s3161_s1 }
   0x7   :  { %p2525_p2 = pnand %p2523_p1, %p2520_p0 }
   0x9   :  { %2528 = shalt.err (!%p2525_p2)
}
   0xa   :  { %s2529_s17 = scalar_lea.vmem %s40_s26, 3072  ;;  %p2534_p4 = scmp.lt.s32.totalorder %s40_s26, %s40_s26 }
   0xb   :  { %p2530_p3 = scmp.ne.s32.totalorder %s40_s26, %s2529_s17  ;;  %p2535_p5 = scmp.lt.s32.totalorder %s2529_s17, %s2529_s17 }
   0xd   :  { %p2536_p6 = por %p2535_p5, %p2534_p4 }
   0xf   :  { %p2537_p7 = pnand %p2536_p6, %p2530_p3 }
  0x11   :  { %2540 = shalt.err (!%p2537_p7)
}
  0x12   :  { %s2660_s18 = smov 192   ;;  %s2661_s19 = smov 12  }
  0x13   :  { %45 = dma.hbm_to_vmem [thread:$0]  %s3161_s1, 3072, %s40_s26, [#allocation6], %s2660_s18, %s2660_s18, %s2661_s19  }
  0x14   :  { %s2662_s22 = smov [#allocation8]   ;;  %s2663_s24 = smov [#allocation2]  }
  0x15   :  { %s71_s23 = sshll.u32 %s2662_s22, 4  ;;  %s27_s25 = sshll.u32 %s2663_s24, 4  ;;  %s72_s23 = int_to_ptr.vmem [resolvable:$true] %s71_s23  ;;  %s28_s25 = int_to_ptr.vmem [resolvable:$true] %s27_s25 }
  0x16   :  { %s2541_s29 = scalar_lea.hbm %s3167_s7, 1024 }
  0x17   :  { %p2542_p8 = scmp.ne.s32.totalorder %s3167_s7, %s2541_s29  ;;  %p2545_p9 = scmp.lt.u32.totalorder %s2541_s29, %s3167_s7 }
  0x19   :  { %p2547_p10 = pnand %p2545_p9, %p2542_p8 }
  0x1b   :  { %2550 = shalt.err (!%p2547_p10)
}
  0x1c   :  { %s2551_s1 = scalar_lea.vmem %s72_s23, 1024  ;;  %p2556_p12 = scmp.lt.s32.totalorder %s72_s23, %s72_s23 }
  0x1d   :  { %p2552_p11 = scmp.ne.s32.totalorder %s72_s23, %s2551_s1  ;;  %p2557_p13 = scmp.lt.s32.totalorder %s2551_s1, %s2551_s1 }
  0x1f   :  { %p2558_p0 = por %p2557_p13, %p2556_p12 }
  0x21   :  { %p2559_p1 = pnand %p2558_p0, %p2552_p11 }
  0x23   :  { %2562 = shalt.err (!%p2559_p1)
}
  0x24   :  { %s2664_s26 = smov 64   ;;  %s2665_s17 = smov 4  }
  0x25   :  { %77 = dma.hbm_to_vmem [thread:$0]  %s3167_s7, 1024, %s72_s23, [#allocation9], %s2664_s26, %s2664_s26, %s2665_s17  }
  0x26   :  { %s2563_s22 = scalar_lea.hbm %s3160_s0, 256 }
  0x27   :  { %p2564_p2 = scmp.ne.s32.totalorder %s3160_s0, %s2563_s22  ;;  %p2567_p3 = scmp.lt.u32.totalorder %s2563_s22, %s3160_s0 }
  0x29   :  { %p2569_p4 = pnand %p2567_p3, %p2564_p2 }
  0x2b   :  { %2572 = shalt.err (!%p2569_p4)
}
  0x2c   :  { %s2573_s30 = scalar_lea.vmem %s28_s25, 256  ;;  %p2578_p6 = scmp.lt.s32.totalorder %s28_s25, %s28_s25 }
  0x2d   :  { %p2574_p5 = scmp.ne.s32.totalorder %s28_s25, %s2573_s30  ;;  %p2579_p7 = scmp.lt.s32.totalorder %s2573_s30, %s2573_s30 }
  0x2f   :  { %p2580_p8 = por %p2579_p7, %p2578_p6 }
  0x31   :  { %p2581_p9 = pnand %p2580_p8, %p2574_p5 }
  0x33   :  { %2584 = shalt.err (!%p2581_p9)
}
  0x34   :  { %s2666_s7 = smov 128   ;;  %s2667_s23 = smov 8  }
  0x35   :  { %33 = dma.hbm_to_vmem [thread:$0]  %s3160_s0, 256, %s28_s25, [#allocation3], %s2666_s7, %s2666_s7, %s2667_s23  }
  0x36   :  { %s2668_s16 = smov [#allocation7]   ;;  %s2669_s18 = smov [#allocation10]  }
  0x37   :  { %s53_s1 = sshll.u32 %s2668_s16, 4  ;;  %s85_s19 = sshll.u32 %s2669_s18, 4  ;;  %s54_s1 = int_to_ptr.vmem [resolvable:$true] %s53_s1  ;;  %s86_s19 = int_to_ptr.vmem [resolvable:$true] %s85_s19 }
  0x38   :  { %s2585_s22 = scalar_lea.hbm %s3163_s3, 1024 }
  0x39   :  { %p2586_p10 = scmp.ne.s32.totalorder %s3163_s3, %s2585_s22  ;;  %p2589_p11 = scmp.lt.u32.totalorder %s2585_s22, %s3163_s3 }
  0x3b   :  { %p2591_p12 = pnand %p2589_p11, %p2586_p10 }
  0x3d   :  { %2594 = shalt.err (!%p2591_p12)
}
  0x3e   :  { %s2595_s0 = scalar_lea.vmem %s54_s1, 1024  ;;  %p2600_p0 = scmp.lt.s32.totalorder %s54_s1, %s54_s1 }
  0x3f   :  { %p2596_p13 = scmp.ne.s32.totalorder %s54_s1, %s2595_s0  ;;  %p2601_p1 = scmp.lt.s32.totalorder %s2595_s0, %s2595_s0 }
  0x41   :  { %p2602_p2 = por %p2601_p1, %p2600_p0 }
  0x43   :  { %p2603_p3 = pnand %p2602_p2, %p2596_p13 }
  0x45   :  { %2606 = shalt.err (!%p2603_p3)
}
  0x46   :  { %59 = dma.hbm_to_vmem [thread:$0]  %s3163_s3, 1024, %s54_s1, [#allocation6], %s2664_s26, %s2664_s26, %s2665_s17  }
  0x47   :  { %s2607_s16 = scalar_lea.hbm %s3169_s9, 1024 }
  0x48   :  { %p2608_p4 = scmp.ne.s32.totalorder %s3169_s9, %s2607_s16  ;;  %p2611_p5 = scmp.lt.u32.totalorder %s2607_s16, %s3169_s9 }
  0x4a   :  { %p2613_p6 = pnand %p2611_p5, %p2608_p4 }
  0x4c   :  { %2616 = shalt.err (!%p2613_p6)
}
  0x4d   :  { %s2617_s24 = scalar_lea.vmem %s86_s19, 1024  ;;  %p2622_p8 = scmp.lt.s32.totalorder %s86_s19, %s86_s19 }
  0x4e   :  { %p2618_p7 = scmp.ne.s32.totalorder %s86_s19, %s2617_s24  ;;  %p2623_p9 = scmp.lt.s32.totalorder %s2617_s24, %s2617_s24 }
  0x50   :  { %p2624_p10 = por %p2623_p9, %p2622_p8 }
  0x52   :  { %p2625_p11 = pnand %p2624_p10, %p2618_p7 }
  0x54   :  { %2628 = shalt.err (!%p2625_p11)
}
  0x55   :  { %91 = dma.hbm_to_vmem [thread:$0]  %s3169_s9, 1024, %s86_s19, [#allocation9], %s2664_s26, %s2664_s26, %s2665_s17  }
  0x56   :  { %2651 = dma.done.wait [#allocation3], 256  }
  0x57   :  { %2652 = vsyncadd [#allocation3], 4294967040 }
  0x58   :  { %2653 = dma.done.wait [#allocation6], 4096  }
  0x59   :  { %2654 = vsyncadd [#allocation6], 4294963200 }
  0x5a   :  { %2655 = dma.done.wait [#allocation9], 2048  }
  0x5b   :  { %2656 = vsyncadd [#allocation9], 4294965248  ;;  %v2670_v0 = vmov 0   ;;  %v2423_v1 = vld [vmem:[#allocation5 + $0x4] ss:$12 sps:$4 sm:$0xff]   ;;  %v2820_v18 = vld [vmem:[#allocation2 + $0x8] sm:$0xff]  ;;  %v151_v21 = vlaneseq }
  0x5c   :  { %326 = vmatprep.mubr.bf16.mxu0 %v2670_v0  ;;  %v2425_v2 = vld [vmem:[#allocation5] ss:$12 sps:$4 sm:$0xff]   ;;  %294 = vmatprep.subr.bf16.mxu0 %v2423_v1  ;;  %v2426_v3 = vld [vmem:[#allocation5 + $0x1c] ss:$12 sps:$4 sm:$0xff]   ;;  %v2428_v4 = vld [vmem:[#allocation5 + $0x18] ss:$12 sps:$4 sm:$0xff]  }
  0x5d   :  { %295 = vmatpush1.bf16.msra.mxu0 %v2425_v2  ;;  %v2429_v5 = vld [vmem:[#allocation5 + $0x34] ss:$12 sps:$4 sm:$0xff]   ;;  %v2431_v6 = vld [vmem:[#allocation5 + $0x30] ss:$12 sps:$4 sm:$0xff]   ;;  %v2432_v7 = vld [vmem:[#allocation5 + $0x4c] ss:$12 sps:$4 sm:$0xff]  }
  0x5e   :  { %296 = vmatprep.subr.bf16.mxu0 %v2426_v3  ;;  %v2434_v8 = vld [vmem:[#allocation5 + $0x48] ss:$12 sps:$4 sm:$0xff]   ;;  %v2435_v9 = vld [vmem:[#allocation5 + $0x64] ss:$12 sps:$4 sm:$0xff]   ;;  %v2437_v10 = vld [vmem:[#allocation5 + $0x60] ss:$12 sps:$4 sm:$0xff]  }
  0x5f   :  { %v2438_v11 = vld [vmem:[#allocation5 + $0x7c] ss:$12 sps:$4 sm:$0xff]   ;;  %v2440_v12 = vld [vmem:[#allocation5 + $0x78] ss:$12 sps:$4 sm:$0xff]   ;;  %v2441_v13 = vld [vmem:[#allocation5 + $0x94] ss:$12 sps:$4 sm:$0xff]  }
  0x60   :  { %v2443_v14 = vld [vmem:[#allocation5 + $0x90] ss:$12 sps:$4 sm:$0xff]   ;;  %v2444_v15 = vld [vmem:[#allocation5 + $0xac] ss:$12 sps:$4 sm:$0xff]   ;;  %v2446_v16 = vld [vmem:[#allocation5 + $0xa8] ss:$12 sps:$4 sm:$0xff]  }
  0x61   :  { %297 = vmatpush1.bf16.msra.mxu0 %v2428_v4  ;;  %v2818_v17 = vld [vmem:[#allocation2] sm:$0xff]  ;;  %v2671_v20 = vmov 0.0   ;;  %vm2672_vm0 = vmmov 0   ;;  %v2833_v22 = vshrl.u32 %v151_v21, 7  ;;  %vm397_vm1 = vcmask 261120   ;;  %s2674_s19 = smov 32  }
  0x62   :  { %298 = vmatprep.subr.bf16.mxu0 %v2429_v5  ;;  %v2824_v19 = vpack.c.bf16 %v2820_v18, %v2818_v17  ;;  %2186 = vmatprep.subr.bf16.mxu1 %v2671_v20  ;;  %v2839_v24 = vld [vmem:[%s3162_s2] sm:$0x7]  ;;  %s2673_s2 = smov 96   ;;  %v2447_v39 = vld [vmem:[#allocation5 + $0x8] ss:$12 sps:$4 sm:$0xff]   ;;  %vm444_vm2 = vcmask 64512  }
  0x63   :  { %2202 = vmatprep.mubr.msk.bf16.mxu1 %vm2672_vm0, %v2671_v20  ;;  %v157_v23 = vsub.s32 1, %v2833_v22  ;;  %v153_v25 = vsub.s32 0, %v2833_v22  ;;  %2187 = vmatpush3.bf16.msra.mxu1 %v2447_v39  ;;  %v2448_v40 = vld [vmem:[#allocation5 + $0x20] ss:$12 sps:$4 sm:$0xff]   ;;  %v2449_v41 = vld [vmem:[#allocation5 + $0x38] ss:$12 sps:$4 sm:$0xff]  }
  0x64   :  { %2188 = vmatprep.subr.bf16.mxu1 %v2671_v20  ;;  %v2450_v42 = vld [vmem:[#allocation5 + $0x50] ss:$12 sps:$4 sm:$0xff]   ;;  %v2451_v43 = vld [vmem:[#allocation5 + $0x68] ss:$12 sps:$4 sm:$0xff]   ;;  %v2452_v44 = vld [vmem:[#allocation5 + $0x80] ss:$12 sps:$4 sm:$0xff]  }
  0x65   :  { %299 = vmatpush1.bf16.msra.mxu0 %v2431_v6  ;;  %v158_v26 = vrot.slane %v2839_v24, %v157_v23  ;;  %v154_v27 = vrot.slane %v2839_v24, %v153_v25  ;;  %v2453_v47 = vld [vmem:[#allocation5 + $0x98] ss:$12 sps:$4 sm:$0xff]   ;;  %v2454_v48 = vld [vmem:[#allocation5 + $0xb0] ss:$12 sps:$4 sm:$0xff]   ;;  %v161_v3 = vsub.s32 2, %v2833_v22  ;;  %vm460_vm3 = vcmask 1043456  }
  0x66   :  { %300 = vmatprep.subr.bf16.mxu0 %v2432_v7  ;;  %v2903_v23 = vld [vmem:[#allocation7 + $0x10] sm:$0xff]   ;;  %s2675_s16 = smov [#allocation11]  }
  0x67   :  { %2189 = vmatpush3.bf16.msra.mxu1 %v2448_v40  ;;  %v162_v4 = vrot.slane %v2839_v24, %v161_v3  ;;  %v2906_v24 = vld [vmem:[#allocation7 + $0x18] sm:$0xff]   ;;  %s2010_s18 = sshll.u32 %s2675_s16, 4  ;;  %s2011_s18 = int_to_ptr.vmem [resolvable:$true] %s2010_s18 }
  0x68   :  { %2190 = vmatprep.subr.bf16.mxu1 %v2671_v20  ;;  %s2629_s20 = scalar_lea.vmem %s2011_s18, 256  ;;  %p2634_p13 = scmp.lt.s32.totalorder %s2011_s18, %s2011_s18 }
  0x69   :  { %301 = vmatpush1.bf16.msra.mxu0 %v2434_v8  ;;  %p2630_p12 = scmp.ne.s32.totalorder %s2011_s18, %s2629_s20  ;;  %p2635_p0 = scmp.lt.s32.totalorder %s2629_s20, %s2629_s20 }
  0x6a   :  { %302 = vmatprep.subr.bf16.mxu0 %v2435_v9 }
  0x6b   :  { %2191 = vmatpush3.bf16.msra.mxu1 %v2449_v41  ;;  %p2636_p1 = por %p2635_p0, %p2634_p13 }
  0x6c   :  { %2192 = vmatprep.subr.bf16.mxu1 %v2671_v20 }
  0x6d   :  { %303 = vmatpush1.bf16.msra.mxu0 %v2437_v10  ;;  %p2637_p2 = pnand %p2636_p1, %p2630_p12 }
  0x6e   :  { %304 = vmatprep.subr.bf16.mxu0 %v2438_v11 }
  0x6f   :  { %2193 = vmatpush3.bf16.msra.mxu1 %v2450_v42 }
  0x70   :  { %2194 = vmatprep.subr.bf16.mxu1 %v2671_v20 }
  0x71   :  { %305 = vmatpush1.bf16.msra.mxu0 %v2440_v12 }
  0x72   :  { %306 = vmatprep.subr.bf16.mxu0 %v2441_v13 }
  0x73   :  { %2195 = vmatpush3.bf16.msra.mxu1 %v2451_v43 }
  0x74   :  { %2196 = vmatprep.subr.bf16.mxu1 %v2671_v20 }
  0x75   :  { %307 = vmatpush1.bf16.msra.mxu0 %v2443_v14 }
  0x76   :  { %308 = vmatprep.subr.bf16.mxu0 %v2444_v15 }
  0x77   :  { %2197 = vmatpush3.bf16.msra.mxu1 %v2452_v44 }
  0x78   :  { %2198 = vmatprep.subr.bf16.mxu1 %v2671_v20 }
  0x79   :  { %309 = vmatpush1.bf16.msra.mxu0 %v2446_v16 }
  0x7a   :  { %2206 = vmatprep.subr.bf16.mxu0 %v2671_v20 }
  0x7b   :  { %2199 = vmatpush3.bf16.msra.mxu1 %v2453_v47 }
  0x7c   :  { %327 = vmatmul.mubr.bf16.vlgmr.msra.gmra.mrb[0].mxu0 %v2824_v19  ;;  %2200 = vmatprep.subr.bf16.mxu1 %v2671_v20 }
  0x7d   :  { %2208 = vmatprep.mubr.msk.bf16.mxu0 %vm2672_vm0, %v2671_v20 }
  0x7f   :  { %2201 = vmatpush3.bf16.msra.mxu1 %v2454_v48 }
  0x80   :  { %2212 = vmatprep.subr.bf16.mxu1 %v2671_v20 }
  0x82   :  { %2203 = vmatmul.mubr.bf16.vlgmr.msra.gmra.mrb[0].mxu1 %v2824_v19 }
  0x83   :  { %2214 = vmatprep.mubr.msk.bf16.mxu1 %vm2672_vm0, %v2671_v20 }
 0x14f   :  { %v328_v28 = vpop.f32.mrb[0].mxu0 }
 0x150   :  { %v330_v29 = vpop.f32.mrb[1].mxu0  ;;  %v329_v34 = vadd.f32 %v328_v28, %v154_v27 }
 0x151   :  { %v331_v30 = vadd.f32 %v330_v29, %v158_v26  ;;  %v332_v31 = vpop.f32.mrb[2].mxu0 }
 0x152   :  { %v2844_v32 = vadd.f32 %v332_v31, %v154_v27  ;;  %v334_v33 = vpop.f32.mrb[3].mxu0  ;;  %v2854_v38 = vpack.c.bf16 %v329_v34, %v329_v34 }
 0x153   :  { %v2846_v35 = vpack.c.bf16 %v331_v30, %v331_v30  ;;  %v2848_v36 = vadd.f32 %v334_v33, %v158_v26  ;;  %v2913_v30 = vld [vmem:[#allocation7] sm:$0xff]   ;;  %v2917_v33 = vld [vmem:[#allocation7 + $0x8] sm:$0xff]  }
 0x155   :  { %509 = vrot.lane.b32.xlu0 %v2846_v35, %s2673_s2  ;;  %v402_v37 = vsel %vm397_vm1, %v2846_v35, 0  ;;  %v371_v63 = vpop.f32.mrb[0].mxu1 }
 0x156   :  { %2207 = vmatpush3.bf16.xpose.msra.mxu0 %v402_v37  ;;  %v2204_v0 = vpop.f32.mrb[1].mxu1  ;;  %v372_v5 = vadd.f32 %v371_v63, %v162_v4 }
 0x157   :  { %2218 = vmatprep.subr.bf16.mxu0 %v2671_v20  ;;  %v374_v6 = vpop.f32.mrb[2].mxu1 }
 0x158   :  { %v2884_v7 = vpack.c.bf16 %v372_v5, %v372_v5  ;;  %v2205_v8 = vpop.f32.mrb[3].mxu1  ;;  %v2886_v9 = vadd.f32 %v374_v6, %v162_v4 }
 0x159   :  { %506 = vrot.lane.b32.xlu0 %v2854_v38, %s2673_s2  ;;  %v2945_v8 = vld [vmem:[#allocation7 + $0x20] sm:$0xff]  }
 0x15a   :  { %v462_v10 = vsel %vm460_vm3, %v2884_v7, 0 }
 0x15b   :  { %2213 = vmatpush3.bf16.msra.mxu1 %v462_v10 }
 0x15c   :  { %2224 = vmatprep.subr.bf16.mxu1 %v2671_v20 }
 0x15d   :  { %2209 = vmatmul.mubr.msk.bf16.vlgmr.msra.gmra.mrb[4].mxu0 %vm397_vm1, %v2854_v38 }
 0x15e   :  { %2220 = vmatprep.mubr.msk.bf16.mxu0 %vm2672_vm0, %v2671_v20 }
 0x1c7   :  { %v510_v45 = vpop.permute.xlu0 %509 }
 0x1c8   :  { %v515_v46 = vsel %vm397_vm1, %v510_v45, 0 }
 0x1c9   :  { %2219 = vmatpush3.bf16.xpose.msra.mxu0 %v515_v46 }
 0x1ca   :  { %2230 = vmatprep.subr.bf16.mxu0 %v2671_v20 }
 0x1cb   :  { %v507_v49 = vpop.permute.xlu0 %506 }
 0x1d0   :  { %2221 = vmatmul.mubr.msk.bf16.vlgmr.msra.gmra.mrb[8].mxu0 %vm397_vm1, %v507_v49 }
 0x1d1   :  { %2234 = vmatprep.mubr.msk.bf16.mxu0 %vm2672_vm0, %v2671_v20  ;;  %2231 = vmatpush3.bf16.msra.mxu0 %v2903_v23 }
 0x1d2   :  { %2232 = vmatprep.subr.bf16.mxu0 %v2671_v20 }
 0x1d5   :  { %2233 = vmatpush3.bf16.msra.mxu0 %v2906_v24 }
 0x1d6   :  { %2246 = vmatprep.subr.bf16.mxu0 %v2671_v20 }
 0x230   :  { %v438_v50 = vpop.f32.mrb[4].mxu0 }
 0x231   :  { %v2210_v51 = vpop.f32.mrb[5].mxu0  ;;  %v445_v52 = vsel %vm444_vm2, %v438_v50, -inf }
 0x232   :  { %446 = vmax.xlane.f32.xlu1 %v445_v52  ;;  %v441_v53 = vpop.f32.mrb[6].mxu0 }
 0x233   :  { %v2211_v54 = vpop.f32.mrb[7].mxu0 }
 0x2a3   :  { %v551_v55 = vpop.f32.mrb[8].mxu0 }
 0x2a4   :  { %v2222_v56 = vpop.f32.mrb[9].mxu0  ;;  %v557_v57 = vsel %vm444_vm2, %v551_v55, -inf }
 0x2a5   :  { %558 = vmax.xlane.f32.xlu1 %v557_v57  ;;  %v554_v58 = vpop.f32.mrb[10].mxu0 }
 0x2a6   :  { %v2223_v59 = vpop.f32.mrb[11].mxu0 }
 0x2bf   :  { %v447_v60 = vpop.xlane.xlu1 %446 }
 0x2c0   :  { %v448_v61 = vsub.f32 %v438_v50, %v447_v60 }
 0x2c2   :  { %v449_v62 = vmul.f32 1.442695, %v448_v61 }
 0x2c4   :  { %2479 = vpow2.f32 %v449_v62 }
 0x2ce   :  { %v2480_v1 = vpop.eup %2479 }
 0x2cf   :  { %v451_v2 = vsel %vm444_vm2, %v2480_v1, 0.0 }
 0x2d0   :  { %452 = vadd.xlane.f32.xlu0 %v451_v2 }
 0x2e6   :  { %791 = vrot.lane.b32.xlu0 %v2884_v7, %s2664_s26 }
 0x332   :  { %v559_v11 = vpop.xlane.xlu1 %558 }
 0x333   :  { %v560_v12 = vsub.f32 %v551_v55, %v559_v11 }
 0x335   :  { %v561_v13 = vmul.f32 1.442695, %v560_v12 }
 0x337   :  { %2481 = vpow2.f32 %v561_v13 }
 0x341   :  { %v2482_v14 = vpop.eup %2481 }
 0x342   :  { %v563_v15 = vsel %vm444_vm2, %v2482_v14, 0.0 }
 0x343   :  { %564 = vadd.xlane.f32.xlu1 %v563_v15 }
 0x354   :  { %570 = vrot.lane.b32.xlu1 %v2884_v7, %s2673_s2 }
 0x358   :  { %731 = vrot.lane.b32.xlu1 %v2846_v35, %s2664_s26 }
 0x35c   :  { %729 = vrot.lane.b32.xlu1 %v2854_v38, %s2664_s26 }
 0x35d   :  { %v453_v16 = vpop.xlane.xlu0 %452 }
 0x35e   :  { %2483 = vrcp.f32 %v453_v16 }
 0x361   :  { %v792_v34 = vpop.permute.xlu0 %791 }
 0x362   :  { %v797_v42 = vsel %vm460_vm3, %v792_v34, 0 }
 0x368   :  { %v2484_v19 = vpop.eup %2483 }
 0x369   :  { %v455_v21 = vmul.f32 %v2484_v19, %v2480_v1 }
 0x36b   :  { %v456_v22 = vpack.c.bf16 %v455_v21, %v455_v21 }
 0x36d   :  { %2215 = vmatmul.mubr.msk.bf16.vlgmr.msra.gmra.mrb[4].mxu1 %vm444_vm2, %v456_v22 }
 0x36e   :  { %2226 = vmatprep.mubr.msk.bf16.mxu1 %vm2672_vm0, %v2671_v20 }
 0x3d0   :  { %v565_v25 = vpop.xlane.xlu1 %564 }
 0x3d1   :  { %2485 = vrcp.f32 %v565_v25 }
 0x3d4   :  { %v571_v26 = vpop.permute.xlu1 %570 }
 0x3d5   :  { %v576_v27 = vsel %vm460_vm3, %v571_v26, 0 }
 0x3d6   :  { %2225 = vmatpush3.bf16.msra.mxu1 %v576_v27 }
 0x3d7   :  { %2238 = vmatprep.subr.bf16.mxu1 %v2671_v20 }
 0x3d8   :  { %v732_v44 = vpop.permute.xlu1 %731 }
 0x3d9   :  { %v737_v49 = vsel %vm397_vm1, %v732_v44, 0  ;;  %v2980_v44 = vld [vmem:[#allocation7 + $0x30] sm:$0xff]  }
 0x3db   :  { %v2486_v28 = vpop.eup %2485 }
 0x3dc   :  { %v567_v29 = vmul.f32 %v2486_v28, %v2482_v14  ;;  %v730_v51 = vpop.permute.xlu1 %729 }
 0x3de   :  { %v568_v31 = vpack.c.bf16 %v567_v29, %v567_v29 }
 0x3e0   :  { %2227 = vmatmul.mubr.msk.bf16.vlgmr.msra.gmra.mrb[8].mxu1 %vm444_vm2, %v568_v31 }
 0x3e1   :  { %2239 = vmatpush3.bf16.msra.mxu1 %v2913_v30  ;;  %2242 = vmatprep.mubr.msk.bf16.mxu1 %vm2672_vm0, %v2671_v20 }
 0x3e2   :  { %2240 = vmatprep.subr.bf16.mxu1 %v2671_v20 }
 0x3e5   :  { %2241 = vmatpush3.bf16.msra.mxu1 %v2917_v33 }
 0x3e6   :  { %2252 = vmatprep.subr.bf16.mxu1 %v2671_v20 }
 0x440   :  { %v498_v37 = vpop.f32.mrb[4].mxu1 }
 0x441   :  { %v504_v39 = vpack.c.bf16 %v498_v37, %v498_v37  ;;  %v2216_v40 = vpop.f32.mrb[5].mxu1 }
 0x442   :  { %v501_v41 = vpop.f32.mrb[6].mxu1 }
 0x443   :  { %v2217_v43 = vpop.f32.mrb[7].mxu1  ;;  %2243 = vmatmul.mubr.msk.bf16.vlgmr.msra.gmra.mrb[12].mxu1 %vm397_vm1, %v504_v39 }
 0x444   :  { %2253 = vmatpush3.bf16.msra.mxu1 %v797_v42  ;;  %2254 = vmatprep.mubr.msk.bf16.mxu1 %vm2672_vm0, %v2671_v20  ;;  %v2970_v42 = vpack.c.bf16 %v2848_v36, %v2848_v36  ;;  %v2976_v43 = vpack.c.bf16 %v2844_v32, %v2844_v32  ;;  %v2986_v36 = vld [vmem:[#allocation7 + $0x38] sm:$0xff]  }
 0x445   :  { %2266 = vmatprep.subr.bf16.mxu1 %v2671_v20 }
 0x4b3   :  { %v612_v45 = vpop.f32.mrb[8].mxu1 }
 0x4b4   :  { %v618_v46 = vpack.c.bf16 %v612_v45, %v612_v45  ;;  %v2228_v47 = vpop.f32.mrb[9].mxu1 }
 0x4b5   :  { %v615_v48 = vpop.f32.mrb[10].mxu1 }
 0x4b6   :  { %v2229_v50 = vpop.f32.mrb[11].mxu1  ;;  %2235 = vmatmul.mubr.msk.bf16.vlgmr.msra.gmra.mrb[12].mxu0 %vm397_vm1, %v618_v46 }
 0x4b7   :  { %2247 = vmatpush3.bf16.xpose.msra.mxu0 %v737_v49  ;;  %2248 = vmatprep.mubr.msk.bf16.mxu0 %vm2672_vm0, %v2671_v20 }
 0x4b8   :  { %2258 = vmatprep.subr.bf16.mxu0 %v2671_v20 }
 0x4be   :  { %2249 = vmatmul.mubr.msk.bf16.vlgmr.msra.gmra.mrb[16].mxu0 %vm397_vm1, %v730_v51 }
 0x4bf   :  { %2262 = vmatprep.mubr.msk.bf16.mxu0 %vm2672_vm0, %v2671_v20  ;;  %2259 = vmatpush3.bf16.msra.mxu0 %v2945_v8 }
 0x4c0   :  { %2260 = vmatprep.subr.bf16.mxu0 %v2671_v20 }
 0x516   :  { %v723_v52 = vpop.f32.mrb[12].mxu1 }
 0x517   :  { %v2244_v53 = vpop.f32.mrb[13].mxu1 }
 0x518   :  { %v726_v54 = vpop.f32.mrb[14].mxu1 }
 0x519   :  { %v2245_v55 = vpop.f32.mrb[15].mxu1  ;;  %v1070_v54 = vsel %vm397_vm1, %v2970_v42, 0 }
 0x589   :  { %v668_v56 = vpop.f32.mrb[12].mxu0 }
 0x58a   :  { %v2937_v57 = vadd.f32 %v723_v52, %v668_v56  ;;  %v2236_v58 = vpop.f32.mrb[13].mxu0 }
 0x58b   :  { %v671_v59 = vpop.f32.mrb[14].mxu0  ;;  %v3014_v58 = vpack.c.bf16 %v2886_v9, %v2886_v9 }
 0x58c   :  { %v2237_v60 = vpop.f32.mrb[15].mxu0 }
 0x591   :  { %v773_v61 = vpop.f32.mrb[16].mxu0 }
 0x592   :  { %v2250_v62 = vpop.f32.mrb[17].mxu0  ;;  %v779_v63 = vsel %vm444_vm2, %v773_v61, -inf }
 0x593   :  { %780 = vmax.xlane.f32.xlu1 %v779_v63  ;;  %v776_v0 = vpop.f32.mrb[18].mxu0 }
 0x594   :  { %v2251_v1 = vpop.f32.mrb[19].mxu0 }
 0x620   :  { %v781_v2 = vpop.xlane.xlu1 %780 }
 0x621   :  { %v782_v3 = vsub.f32 %v773_v61, %v781_v2 }
 0x623   :  { %v783_v4 = vmul.f32 1.442695, %v782_v3 }
 0x625   :  { %2487 = vpow2.f32 %v783_v4 }
 0x62f   :  { %v2488_v5 = vpop.eup %2487 }
 0x630   :  { %v785_v6 = vsel %vm444_vm2, %v2488_v5, 0.0 }
 0x631   :  { %786 = vadd.xlane.f32.xlu0 %v785_v6 }
 0x647   :  { %898 = vrot.lane.b32.xlu0 %v2846_v35, %s2674_s19 }
 0x64b   :  { %896 = vrot.lane.b32.xlu0 %v2854_v38, %s2674_s19  ;;  %v2957_v38 = vld [vmem:[#allocation7 + $0x28] sm:$0xff]  }
 0x64c   :  { %2261 = vmatpush3.bf16.msra.mxu0 %v2957_v38 }
 0x64d   :  { %2272 = vmatprep.subr.bf16.mxu0 %v2671_v20 }
 0x6be   :  { %v787_v10 = vpop.xlane.xlu0 %786 }
 0x6bf   :  { %2489 = vrcp.f32 %v787_v10 }
 0x6c2   :  { %v899_v13 = vpop.permute.xlu0 %898 }
 0x6c3   :  { %v904_v15 = vsel %vm397_vm1, %v899_v13, 0 }
 0x6c6   :  { %v897_v35 = vpop.permute.xlu0 %896 }
 0x6c9   :  { %v2490_v11 = vpop.eup %2489 }
 0x6ca   :  { %v789_v12 = vmul.f32 %v2490_v11, %v2488_v5 }
 0x6cc   :  { %v790_v14 = vpack.c.bf16 %v789_v12, %v789_v12 }
 0x6ce   :  { %2255 = vmatmul.mubr.msk.bf16.vlgmr.msra.gmra.mrb[16].mxu1 %vm444_vm2, %v790_v14 }
 0x6cf   :  { %2267 = vmatpush3.bf16.xpose.msra.mxu1 %v904_v15  ;;  %2268 = vmatprep.mubr.msk.bf16.mxu1 %vm2672_vm0, %v2671_v20 }
 0x6d0   :  { %2278 = vmatprep.subr.bf16.mxu1 %v2671_v20 }
 0x6d6   :  { %2269 = vmatmul.mubr.msk.bf16.vlgmr.msra.gmra.mrb[20].mxu1 %vm397_vm1, %v897_v35 }
 0x6d7   :  { %2282 = vmatprep.mubr.msk.bf16.mxu1 %vm2672_vm0, %v2671_v20  ;;  %2279 = vmatpush3.bf16.msra.mxu1 %v2980_v44 }
 0x6d8   :  { %2280 = vmatprep.subr.bf16.mxu1 %v2671_v20 }
 0x6db   :  { %2281 = vmatpush3.bf16.msra.mxu1 %v2986_v36 }
 0x6dc   :  { %2292 = vmatprep.subr.bf16.mxu1 %v2671_v20 }
 0x7a1   :  { %v833_v16 = vpop.f32.mrb[16].mxu1 }
 0x7a2   :  { %v839_v19 = vpack.c.bf16 %v833_v16, %v833_v16  ;;  %v2256_v21 = vpop.f32.mrb[17].mxu1 }
 0x7a3   :  { %v836_v22 = vpop.f32.mrb[18].mxu1 }
 0x7a4   :  { %v2257_v25 = vpop.f32.mrb[19].mxu1  ;;  %2263 = vmatmul.mubr.msk.bf16.vlgmr.msra.gmra.mrb[20].mxu0 %vm397_vm1, %v839_v19 }
 0x7a5   :  { %2274 = vmatprep.mubr.msk.bf16.mxu0 %vm2672_vm0, %v2671_v20 }
 0x7a9   :  { %v940_v26 = vpop.f32.mrb[20].mxu1 }
 0x7aa   :  { %v2270_v27 = vpop.f32.mrb[21].mxu1  ;;  %v946_v28 = vsel %vm444_vm2, %v940_v26, -inf }
 0x7ab   :  { %947 = vmax.xlane.f32.xlu0 %v946_v28  ;;  %v943_v29 = vpop.f32.mrb[22].mxu1 }
 0x7ac   :  { %v2271_v31 = vpop.f32.mrb[23].mxu1 }
 0x838   :  { %v948_v34 = vpop.xlane.xlu0 %947 }
 0x839   :  { %v949_v37 = vsub.f32 %v940_v26, %v948_v34 }
 0x83b   :  { %v950_v39 = vmul.f32 1.442695, %v949_v37 }
 0x83d   :  { %2491 = vpow2.f32 %v950_v39 }
 0x847   :  { %v2492_v40 = vpop.eup %2491 }
 0x848   :  { %v952_v41 = vsel %vm444_vm2, %v2492_v40, 0.0 }
 0x849   :  { %953 = vadd.xlane.f32.xlu1 %v952_v41 }
 0x85a   :  { %958 = vrot.lane.b32.xlu1 %v2884_v7, %s2674_s19 }
 0x85e   :  { %1175 = vrot.lane.b32.xlu1 %v2970_v42, %s2673_s2 }
 0x862   :  { %1172 = vrot.lane.b32.xlu1 %v2976_v43, %s2673_s2 }
 0x877   :  { %v889_v45 = vpop.f32.mrb[20].mxu0 }
 0x878   :  { %v2983_v46 = vadd.f32 %v889_v45, %v2937_v57  ;;  %v2264_v7 = vpop.f32.mrb[21].mxu0 }
 0x879   :  { %v892_v47 = vpop.f32.mrb[22].mxu0 }
 0x87a   :  { %v2265_v48 = vpop.f32.mrb[23].mxu0 }
 0x8d6   :  { %v954_v32 = vpop.xlane.xlu1 %953 }
 0x8d7   :  { %2493 = vrcp.f32 %v954_v32 }
 0x8da   :  { %v959_v49 = vpop.permute.xlu1 %958 }
 0x8db   :  { %v964_v50 = vsel %vm460_vm3, %v959_v49, 0 }
 0x8dc   :  { %2273 = vmatpush3.bf16.msra.mxu0 %v964_v50 }
 0x8dd   :  { %2286 = vmatprep.subr.bf16.mxu0 %v2671_v20 }
 0x8de   :  { %v1176_v55 = vpop.permute.xlu1 %1175 }
 0x8df   :  { %v1181_v56 = vsel %vm397_vm1, %v1176_v55, 0 }
 0x8e1   :  { %v2494_v51 = vpop.eup %2493 }
 0x8e2   :  { %v956_v52 = vmul.f32 %v2494_v51, %v2492_v40  ;;  %v1173_v57 = vpop.permute.xlu1 %1172 }
 0x8e4   :  { %v957_v53 = vpack.c.bf16 %v956_v52, %v956_v52 }
 0x8e6   :  { %2275 = vmatmul.mubr.msk.bf16.vlgmr.msra.gmra.mrb[24].mxu0 %vm444_vm2, %v957_v53 }
 0x8e7   :  { %2287 = vmatpush3.bf16.xpose.msra.mxu0 %v1070_v54  ;;  %2288 = vmatprep.mubr.msk.bf16.mxu0 %vm2672_vm0, %v2671_v20 }
 0x8e8   :  { %2298 = vmatprep.subr.bf16.mxu0 %v2671_v20 }
 0x8ee   :  { %2289 = vmatmul.mubr.msk.bf16.vlgmr.msra.gmra.mrb[28].mxu0 %vm397_vm1, %v2976_v43 }
 0x8ef   :  { %2299 = vmatpush3.bf16.xpose.msra.mxu0 %v1181_v56  ;;  %2300 = vmatprep.mubr.msk.bf16.mxu0 %vm2672_vm0, %v2671_v20 }
 0x8f0   :  { %2310 = vmatprep.subr.bf16.mxu0 %v2671_v20 }
 0x8f6   :  { %2301 = vmatmul.mubr.msk.bf16.vlgmr.msra.gmra.mrb[32].mxu0 %vm397_vm1, %v1173_v57 }
 0x8f7   :  { %2311 = vmatpush3.bf16.msra.mxu0 %v2903_v23  ;;  %2314 = vmatprep.mubr.msk.bf16.mxu0 %vm2672_vm0, %v2671_v20  ;;  %v1128_v23 = vsel %vm460_vm3, %v3014_v58, 0 }
 0x8f8   :  { %2312 = vmatprep.subr.bf16.mxu0 %v2671_v20 }
 0x8fb   :  { %2313 = vmatpush3.bf16.msra.mxu0 %v2906_v24 }
 0x8fc   :  { %2326 = vmatprep.subr.bf16.mxu0 %v2671_v20 }
 0x9b9   :  { %v1000_v59 = vpop.f32.mrb[24].mxu0 }
 0x9ba   :  { %v1006_v60 = vpack.c.bf16 %v1000_v59, %v1000_v59  ;;  %v2276_v61 = vpop.f32.mrb[25].mxu0 }
 0x9bb   :  { %v1003_v62 = vpop.f32.mrb[26].mxu0 }
 0x9bc   :  { %v2277_v63 = vpop.f32.mrb[27].mxu0  ;;  %2283 = vmatmul.mubr.msk.bf16.vlgmr.msra.gmra.mrb[24].mxu1 %vm397_vm1, %v1006_v60 }
 0x9bd   :  { %2293 = vmatpush3.bf16.msra.mxu1 %v1128_v23  ;;  %2294 = vmatprep.mubr.msk.bf16.mxu1 %vm2672_vm0, %v2671_v20 }
 0x9be   :  { %2304 = vmatprep.subr.bf16.mxu1 %v2671_v20 }
 0x9c1   :  { %v1106_v24 = vpop.f32.mrb[28].mxu0 }
 0x9c2   :  { %v2290_v0 = vpop.f32.mrb[29].mxu0  ;;  %v1112_v9 = vsel %vm444_vm2, %v1106_v24, -inf }
 0x9c3   :  { %1113 = vmax.xlane.f32.xlu1 %v1112_v9  ;;  %v1109_v1 = vpop.f32.mrb[30].mxu0 }
 0x9c4   :  { %v2291_v2 = vpop.f32.mrb[31].mxu0 }
 0x9c9   :  { %v1217_v3 = vpop.f32.mrb[32].mxu0 }
 0x9ca   :  { %v2302_v4 = vpop.f32.mrb[33].mxu0  ;;  %v1223_v5 = vsel %vm444_vm2, %v1217_v3, -inf }
 0x9cb   :  { %1224 = vmax.xlane.f32.xlu0 %v1223_v5  ;;  %v1220_v6 = vpop.f32.mrb[34].mxu0 }
 0x9cc   :  { %v2303_v10 = vpop.f32.mrb[35].mxu0 }
 0x9d4   :  { %1371 = vrot.lane.b32.xlu1 %v2976_v43, %s2664_s26 }
 0xa50   :  { %v1114_v11 = vpop.xlane.xlu1 %1113 }
 0xa51   :  { %v1115_v12 = vsub.f32 %v1106_v24, %v1114_v11 }
 0xa53   :  { %v1116_v13 = vmul.f32 1.442695, %v1115_v12 }
 0xa54   :  { %v1372_v57 = vpop.permute.xlu1 %1371 }
 0xa55   :  { %2495 = vpow2.f32 %v1116_v13 }
 0xa58   :  { %v1225_v14 = vpop.xlane.xlu0 %1224 }
 0xa59   :  { %v1226_v15 = vsub.f32 %v1217_v3, %v1225_v14 }
 0xa5b   :  { %v1227_v35 = vmul.f32 1.442695, %v1226_v15 }
 0xa5d   :  { %2497 = vpow2.f32 %v1227_v35 }
 0xa5f   :  { %v2496_v16 = vpop.eup %2495 }
 0xa60   :  { %v1118_v19 = vsel %vm444_vm2, %v2496_v16, 0.0 }
 0xa61   :  { %1119 = vadd.xlane.f32.xlu0 %v1118_v19 }
 0xa67   :  { %v2498_v21 = vpop.eup %2497 }
 0xa68   :  { %v1229_v22 = vsel %vm444_vm2, %v2498_v21, 0.0 }
 0xa69   :  { %1230 = vadd.xlane.f32.xlu0 %v1229_v22 }
 0xa7f   :  { %1236 = vrot.lane.b32.xlu0 %v3014_v58, %s2673_s2 }
 0xa83   :  { %1373 = vrot.lane.b32.xlu0 %v2970_v42, %s2664_s26 }
 0xa8f   :  { %v1056_v25 = vpop.f32.mrb[24].mxu1 }
 0xa90   :  { %v3033_v26 = vadd.f32 %v1056_v25, %v2983_v46  ;;  %v2284_v27 = vpop.f32.mrb[25].mxu1 }
 0xa91   :  { %v1059_v28 = vpop.f32.mrb[26].mxu1 }
 0xa92   :  { %v2285_v29 = vpop.f32.mrb[27].mxu1 }
 0xaee   :  { %v1120_v31 = vpop.xlane.xlu0 %1119 }
 0xaef   :  { %2499 = vrcp.f32 %v1120_v31 }
 0xaf6   :  { %v1231_v34 = vpop.xlane.xlu0 %1230 }
 0xaf7   :  { %2501 = vrcp.f32 %v1231_v34 }
 0xaf9   :  { %v2500_v37 = vpop.eup %2499 }
 0xafa   :  { %v1122_v39 = vmul.f32 %v2500_v37, %v2496_v16  ;;  %v1237_v40 = vpop.permute.xlu0 %1236 }
 0xafb   :  { %v1242_v45 = vsel %vm460_vm3, %v1237_v40, 0 }
 0xafc   :  { %v1123_v41 = vpack.c.bf16 %v1122_v39, %v1122_v39 }
 0xafe   :  { %2295 = vmatmul.mubr.msk.bf16.vlgmr.msra.gmra.mrb[28].mxu1 %vm444_vm2, %v1123_v41 }
 0xaff   :  { %2305 = vmatpush3.bf16.msra.mxu1 %v1242_v45  ;;  %2306 = vmatprep.mubr.msk.bf16.mxu1 %vm2672_vm0, %v2671_v20 }
 0xb00   :  { %2318 = vmatprep.subr.bf16.mxu1 %v2671_v20 }
 0xb01   :  { %v2502_v46 = vpop.eup %2501 }
 0xb02   :  { %v1233_v7 = vmul.f32 %v2502_v46, %v2498_v21  ;;  %v2080_v46 = vld [vmem:[%s3164_s4] ss:$0 sm:$0xff] }
 0xb04   :  { %v1234_v47 = vpack.c.bf16 %v1233_v7, %v1233_v7 }
 0xb06   :  { %2307 = vmatmul.mubr.msk.bf16.vlgmr.msra.gmra.mrb[32].mxu1 %vm444_vm2, %v1234_v47  ;;  %v1688_v47 = vadd.f32 %v2080_v46, %v3033_v26 }
 0xb07   :  { %2319 = vmatpush3.bf16.msra.mxu1 %v2913_v30  ;;  %2322 = vmatprep.mubr.msk.bf16.mxu1 %vm2672_vm0, %v2671_v20  ;;  %v1374_v30 = vpop.permute.xlu0 %1373 }
 0xb08   :  { %2320 = vmatprep.subr.bf16.mxu1 %v2671_v20  ;;  %v1379_v56 = vsel %vm397_vm1, %v1374_v30, 0 }
 0xb0b   :  { %2321 = vmatpush3.bf16.msra.mxu1 %v2917_v33 }
 0xb0c   :  { %2332 = vmatprep.subr.bf16.mxu1 %v2671_v20 }
 0xbd1   :  { %v1164_v48 = vpop.f32.mrb[28].mxu1 }
 0xbd2   :  { %v1170_v32 = vpack.c.bf16 %v1164_v48, %v1164_v48  ;;  %v2296_v49 = vpop.f32.mrb[29].mxu1 }
 0xbd3   :  { %v1167_v50 = vpop.f32.mrb[30].mxu1 }
 0xbd4   :  { %v2297_v51 = vpop.f32.mrb[31].mxu1  ;;  %2323 = vmatmul.mubr.msk.bf16.vlgmr.msra.gmra.mrb[36].mxu1 %vm397_vm1, %v1170_v32 }
 0xbd5   :  { %2334 = vmatprep.mubr.msk.bf16.mxu1 %vm2672_vm0, %v2671_v20 }
 0xbd9   :  { %v1278_v52 = vpop.f32.mrb[32].mxu1 }
 0xbda   :  { %v1284_v53 = vpack.c.bf16 %v1278_v52, %v1278_v52  ;;  %v2308_v54 = vpop.f32.mrb[33].mxu1 }
 0xbdb   :  { %v1281_v55 = vpop.f32.mrb[34].mxu1 }
 0xbdc   :  { %v2309_v33 = vpop.f32.mrb[35].mxu1  ;;  %2315 = vmatmul.mubr.msk.bf16.vlgmr.msra.gmra.mrb[36].mxu0 %vm397_vm1, %v1284_v53 }
 0xbdd   :  { %2327 = vmatpush3.bf16.xpose.msra.mxu0 %v1379_v56  ;;  %2328 = vmatprep.mubr.msk.bf16.mxu0 %vm2672_vm0, %v2671_v20 }
 0xbde   :  { %2338 = vmatprep.subr.bf16.mxu0 %v2671_v20 }
 0xbe4   :  { %2329 = vmatmul.mubr.msk.bf16.vlgmr.msra.gmra.mrb[40].mxu0 %vm397_vm1, %v1372_v57 }
 0xbe5   :  { %2339 = vmatpush3.bf16.msra.mxu0 %v2945_v8  ;;  %2342 = vmatprep.mubr.msk.bf16.mxu0 %vm2672_vm0, %v2671_v20 }
 0xbe6   :  { %2340 = vmatprep.subr.bf16.mxu0 %v2671_v20 }
 0xbe9   :  { %2341 = vmatpush3.bf16.msra.mxu0 %v2957_v38 }
 0xbea   :  { %2352 = vmatprep.subr.bf16.mxu0 %v2671_v20 }
 0xca7   :  { %v1365_v59 = vpop.f32.mrb[36].mxu1 }
 0xca8   :  { %v2324_v60 = vpop.f32.mrb[37].mxu1 }
 0xca9   :  { %v1368_v61 = vpop.f32.mrb[38].mxu1 }
 0xcaa   :  { %v2325_v62 = vpop.f32.mrb[39].mxu1 }
 0xcaf   :  { %v1322_v63 = vpop.f32.mrb[36].mxu0 }
 0xcb0   :  { %v3062_v23 = vadd.f32 %v1365_v59, %v1322_v63  ;;  %v2316_v24 = vpop.f32.mrb[37].mxu0 }
 0xcb1   :  { %v1325_v0 = vpop.f32.mrb[38].mxu0 }
 0xcb2   :  { %v2317_v9 = vpop.f32.mrb[39].mxu0 }
 0xcb7   :  { %v1415_v8 = vpop.f32.mrb[40].mxu0 }
 0xcb8   :  { %v2330_v1 = vpop.f32.mrb[41].mxu0  ;;  %v1421_v2 = vsel %vm444_vm2, %v1415_v8, -inf }
 0xcb9   :  { %1422 = vmax.xlane.f32.xlu0 %v1421_v2  ;;  %v1418_v3 = vpop.f32.mrb[42].mxu0  ;;  %v2463_v2 = vld [vmem:[#allocation8] sm:$0xff]  }
 0xcba   :  { %v2331_v4 = vpop.f32.mrb[43].mxu0  ;;  %v2464_v3 = vld [vmem:[#allocation8 + $0x8] sm:$0xff]  }
 0xccf   :  { %1433 = vrot.lane.b32.xlu0 %v3014_v58, %s2664_s26 }
 0xcd3   :  { %1526 = vrot.lane.b32.xlu0 %v2976_v43, %s2674_s19 }
 0xd46   :  { %v1423_v38 = vpop.xlane.xlu0 %1422 }
 0xd47   :  { %v1424_v5 = vsub.f32 %v1415_v8, %v1423_v38 }
 0xd49   :  { %v1425_v6 = vmul.f32 1.442695, %v1424_v5 }
 0xd4a   :  { %v1434_v10 = vpop.permute.xlu0 %1433 }
 0xd4b   :  { %2503 = vpow2.f32 %v1425_v6  ;;  %v1439_v11 = vsel %vm460_vm3, %v1434_v10, 0  ;;  %v2465_v10 = vld [vmem:[#allocation8 + $0x10] sm:$0xff]  }
 0xd4c   :  { %2333 = vmatpush3.bf16.msra.mxu1 %v1439_v11  ;;  %v2466_v11 = vld [vmem:[#allocation8 + $0x18] sm:$0xff]  }
 0xd4d   :  { %2346 = vmatprep.subr.bf16.mxu1 %v2671_v20 }
 0xd4e   :  { %v1527_v21 = vpop.permute.xlu0 %1526 }
 0xd55   :  { %v2504_v12 = vpop.eup %2503 }
 0xd56   :  { %v1427_v13 = vsel %vm444_vm2, %v2504_v12, 0.0 }
 0xd57   :  { %1428 = vadd.xlane.f32.xlu1 %v1427_v13  ;;  %v2469_v13 = vld [vmem:[#allocation8 + $0x30] sm:$0xff]  }
 0xd68   :  { %1528 = vrot.lane.b32.xlu1 %v2970_v42, %s2674_s19 }
 0xde4   :  { %v1429_v14 = vpop.xlane.xlu1 %1428 }
 0xde5   :  { %2505 = vrcp.f32 %v1429_v14  ;;  %v2470_v14 = vld [vmem:[#allocation8 + $0x38] sm:$0xff]  }
 0xde8   :  { %v1529_v35 = vpop.permute.xlu1 %1528 }
 0xde9   :  { %v1534_v19 = vsel %vm397_vm1, %v1529_v35, 0  ;;  %v2473_v35 = vld [vmem:[#allocation10 + $0x10] sm:$0xff]  }
 0xdef   :  { %v2506_v43 = vpop.eup %2505 }
 0xdf0   :  { %v1431_v15 = vmul.f32 %v2506_v43, %v2504_v12  ;;  %v2468_v12 = vld [vmem:[#allocation8 + $0x28] sm:$0xff]   ;;  %v2471_v43 = vld [vmem:[#allocation10] sm:$0xff]  }
 0xdf2   :  { %v1432_v16 = vpack.c.bf16 %v1431_v15, %v1431_v15  ;;  %v2472_v15 = vld [vmem:[#allocation10 + $0x8] sm:$0xff]  }
 0xdf4   :  { %2335 = vmatmul.mubr.msk.bf16.vlgmr.msra.gmra.mrb[40].mxu1 %vm444_vm2, %v1432_v16  ;;  %v2474_v16 = vld [vmem:[#allocation10 + $0x18] sm:$0xff]  }
 0xdf5   :  { %2347 = vmatpush3.bf16.xpose.msra.mxu1 %v1534_v19  ;;  %2348 = vmatprep.mubr.msk.bf16.mxu1 %vm2672_vm0, %v2671_v20  ;;  %v2475_v19 = vld [vmem:[#allocation10 + $0x20] sm:$0xff]  }
 0xdf6   :  { %2358 = vmatprep.subr.bf16.mxu1 %v2671_v20 }
 0xdfc   :  { %2349 = vmatmul.mubr.msk.bf16.vlgmr.msra.gmra.mrb[44].mxu1 %vm397_vm1, %v1527_v21  ;;  %v2476_v21 = vld [vmem:[#allocation10 + $0x28] sm:$0xff]  }
 0xdfd   :  { %2359 = vmatpush3.bf16.msra.mxu1 %v2980_v44  ;;  %2362 = vmatprep.mubr.msk.bf16.mxu1 %vm2672_vm0, %v2671_v20 }
 0xdfe   :  { %2360 = vmatprep.subr.bf16.mxu1 %v2671_v20 }
 0xe01   :  { %2361 = vmatpush3.bf16.msra.mxu1 %v2986_v36 }
 0xe02   :  { %2386 = vmatprep.subr.bf16.mxu1 %v2671_v20 }
 0xec7   :  { %v1475_v42 = vpop.f32.mrb[40].mxu1 }
 0xec8   :  { %v1481_v22 = vpack.c.bf16 %v1475_v42, %v1475_v42  ;;  %v2336_v25 = vpop.f32.mrb[41].mxu1 }
 0xec9   :  { %v1478_v27 = vpop.f32.mrb[42].mxu1 }
 0xeca   :  { %v2337_v28 = vpop.f32.mrb[43].mxu1  ;;  %2343 = vmatmul.mubr.msk.bf16.vlgmr.msra.gmra.mrb[44].mxu0 %vm397_vm1, %v1481_v22 }
 0xecb   :  { %2354 = vmatprep.mubr.msk.bf16.mxu0 %vm2672_vm0, %v2671_v20 }
 0xecf   :  { %v1570_v44 = vpop.f32.mrb[44].mxu1 }
 0xed0   :  { %v2350_v29 = vpop.f32.mrb[45].mxu1  ;;  %v1576_v31 = vsel %vm444_vm2, %v1570_v44, -inf }
 0xed1   :  { %1577 = vmax.xlane.f32.xlu0 %v1576_v31  ;;  %v1573_v34 = vpop.f32.mrb[46].mxu1 }
 0xed2   :  { %v2351_v37 = vpop.f32.mrb[47].mxu1  ;;  %v2081_v34 = vld [vmem:[%s3165_s5] ss:$0 sm:$0xff] }
 0xee7   :  { %1588 = vrot.lane.b32.xlu0 %v3014_v58, %s2674_s19  ;;  %v1690_v58 = vadd.f32 %v1688_v47, %v2818_v17  ;;  %v2477_v47 = vld [vmem:[#allocation10 + $0x30] sm:$0xff]  }
 0xf5e   :  { %v1578_v36 = vpop.xlane.xlu0 %1577 }
 0xf5f   :  { %v1579_v39 = vsub.f32 %v1570_v44, %v1578_v36 }
 0xf61   :  { %v1580_v40 = vmul.f32 1.442695, %v1579_v39 }
 0xf62   :  { %v1589_v41 = vpop.permute.xlu0 %1588 }
 0xf63   :  { %2507 = vpow2.f32 %v1580_v40  ;;  %v1594_v45 = vsel %vm460_vm3, %v1589_v41, 0  ;;  %v2082_v40 = vld [vmem:[%s3166_s6] ss:$0 sm:$0xff] }
 0xf64   :  { %2353 = vmatpush3.bf16.msra.mxu0 %v1594_v45 }
 0xf65   :  { %2366 = vmatprep.subr.bf16.mxu0 %v2671_v20 }
 0xf6d   :  { %v2508_v7 = vpop.eup %2507 }
 0xf6e   :  { %v1582_v48 = vsel %vm444_vm2, %v2508_v7, 0.0 }
 0xf6f   :  { %1583 = vadd.xlane.f32.xlu1 %v1582_v48  ;;  %v2478_v48 = vld [vmem:[#allocation10 + $0x38] sm:$0xff]  }
 0xf73   :  { %1694 = vadd.xlane.f32.xlu1 %v1690_v58 }
 0xf9d   :  { %v1519_v32 = vpop.f32.mrb[44].mxu0 }
 0xf9e   :  { %v1525_v49 = vadd.f32 %v1519_v32, %v3062_v23  ;;  %v2344_v50 = vpop.f32.mrb[45].mxu0 }
 0xf9f   :  { %v1522_v51 = vpop.f32.mrb[46].mxu0 }
 0xfa0   :  { %v2345_v30 = vpop.f32.mrb[47].mxu0 }
 0xffc   :  { %v1584_v52 = vpop.xlane.xlu1 %1583 }
 0xffd   :  { %2509 = vrcp.f32 %v1584_v52 }
0x1000   :  { %v1695_v53 = vpop.xlane.xlu1 %1694 }
0x1001   :  { %v1699_v54 = vmul.f32 0.0078125, %v1695_v53 }
0x1003   :  { %v3101_v55 = vsub.f32 %v1690_v58, %v1699_v54  ;;  %v2083_v58 = vld [vmem:[%s3168_s8] ss:$0 sm:$0xff] }
0x1005   :  { %v1703_v26 = vmul.f32 %v3101_v55, %v3101_v55 }
0x1007   :  { %v2510_v56 = vpop.eup %2509  ;;  %1705 = vadd.xlane.f32.xlu0 %v1703_v26 }
0x1008   :  { %v1586_v33 = vmul.f32 %v2510_v56, %v2508_v7 }
0x100a   :  { %v1587_v17 = vpack.c.bf16 %v1586_v33, %v1586_v33 }
0x100c   :  { %2355 = vmatmul.mubr.msk.bf16.vlgmr.msra.gmra.mrb[48].mxu0 %vm444_vm2, %v1587_v17 }
0x100d   :  { %2382 = vmatprep.mubr.msk.bf16.mxu0 %vm2672_vm0, %v2671_v20  ;;  %2367 = vmatpush3.bf16.msra.mxu0 %v2463_v2 }
0x100e   :  { %2368 = vmatprep.subr.bf16.mxu0 %v2671_v20 }
0x1011   :  { %2369 = vmatpush3.bf16.msra.mxu0 %v2464_v3 }
0x1012   :  { %2370 = vmatprep.subr.bf16.mxu0 %v2671_v20 }
0x1015   :  { %2371 = vmatpush3.bf16.msra.mxu0 %v2465_v10 }
0x1016   :  { %2372 = vmatprep.subr.bf16.mxu0 %v2671_v20 }
0x1019   :  { %2373 = vmatpush3.bf16.msra.mxu0 %v2466_v11  ;;  %v2101_v11 = vld [vmem:[%s3171_s11] ss:$0 sm:$0xff] }
0x101a   :  { %2374 = vmatprep.subr.bf16.mxu0 %v2671_v20 }
0x1094   :  { %v1706_v42 = vpop.xlane.xlu0 %1705 }
0x1095   :  { %v1709_v22 = vmul.f32 0.0078125, %v1706_v42 }
0x1097   :  { %v1711_v25 = vadd.f32 1e-05, %v1709_v22 }
0x1099   :  { %2511 = vrsqrt.f32 %v1711_v25 }
0x10a3   :  { %v2512_v29 = vpop.eup %2511 }
0x10a4   :  { %v1715_v31 = vmul.f32 %v2512_v29, %v3101_v55 }
0x10a6   :  { %v1723_v39 = vmul.f32 %v2081_v34, %v1715_v31 }
0x10a8   :  { %v1731_v45 = vadd.f32 %v2082_v40, %v1723_v39 }
0x10df   :  { %v1630_v57 = vpop.f32.mrb[48].mxu0 }
0x10e0   :  { %v1636_v59 = vpack.c.bf16 %v1630_v57, %v1630_v57  ;;  %v2356_v60 = vpop.f32.mrb[49].mxu0 }
0x10e1   :  { %v1633_v61 = vpop.f32.mrb[50].mxu0 }
0x10e2   :  { %v2357_v62 = vpop.f32.mrb[51].mxu0  ;;  %2363 = vmatmul.mubr.msk.bf16.vlgmr.msra.gmra.mrb[48].mxu1 %vm397_vm1, %v1636_v59 }
0x10e3   :  { %2402 = vmatprep.mubr.msk.bf16.mxu1 %vm2672_vm0, %v2671_v20  ;;  %2387 = vmatpush3.bf16.msra.mxu1 %v2471_v43 }
0x10e4   :  { %2388 = vmatprep.subr.bf16.mxu1 %v2671_v20 }
0x10e7   :  { %2389 = vmatpush3.bf16.msra.mxu1 %v2472_v15 }
0x10e8   :  { %2390 = vmatprep.subr.bf16.mxu1 %v2671_v20 }
0x10eb   :  { %2391 = vmatpush3.bf16.msra.mxu1 %v2473_v35 }
0x10ec   :  { %2392 = vmatprep.subr.bf16.mxu1 %v2671_v20 }
0x10ef   :  { %2393 = vmatpush3.bf16.msra.mxu1 %v2474_v16 }
0x10f0   :  { %2394 = vmatprep.subr.bf16.mxu1 %v2671_v20 }
0x10f3   :  { %2395 = vmatpush3.bf16.msra.mxu1 %v2475_v19 }
0x10f4   :  { %2396 = vmatprep.subr.bf16.mxu1 %v2671_v20 }
0x10f7   :  { %2397 = vmatpush3.bf16.msra.mxu1 %v2476_v21 }
0x10f8   :  { %2398 = vmatprep.subr.bf16.mxu1 %v2671_v20 }
0x10fb   :  { %2399 = vmatpush3.bf16.msra.mxu1 %v2477_v47 }
0x10fc   :  { %2400 = vmatprep.subr.bf16.mxu1 %v2671_v20 }
0x10ff   :  { %2401 = vmatpush3.bf16.msra.mxu1 %v2478_v48 }
0x11b5   :  { %v1674_v63 = vpop.f32.mrb[48].mxu1 }
0x11b6   :  { %v1680_v23 = vadd.f32 %v1674_v63, %v1525_v49  ;;  %v2364_v24 = vpop.f32.mrb[49].mxu1 }
0x11b7   :  { %v1677_v0 = vpop.f32.mrb[50].mxu1 }
0x11b8   :  { %v1689_v9 = vadd.f32 %v2080_v46, %v1680_v23  ;;  %v2365_v8 = vpop.f32.mrb[51].mxu1 }
0x11ba   :  { %v1691_v1 = vadd.f32 %v1689_v9, %v2820_v18  ;;  %v2467_v18 = vld [vmem:[#allocation8 + $0x20] sm:$0xff]  }
0x11bb   :  { %2375 = vmatpush3.bf16.msra.mxu0 %v2467_v18 }
0x11bc   :  { %1696 = vadd.xlane.f32.xlu1 %v1691_v1  ;;  %2376 = vmatprep.subr.bf16.mxu0 %v2671_v20 }
0x11bf   :  { %2377 = vmatpush3.bf16.msra.mxu0 %v2468_v12  ;;  %v2102_v12 = vld [vmem:[%s3172_s12] ss:$0 sm:$0xff] }
0x11c0   :  { %2378 = vmatprep.subr.bf16.mxu0 %v2671_v20 }
0x11c3   :  { %2379 = vmatpush3.bf16.msra.mxu0 %v2469_v13 }
0x11c4   :  { %2380 = vmatprep.subr.bf16.mxu0 %v2671_v20  ;;  %v2092_v20 = vld [vmem:[%s3170_s10] ss:$0 sm:$0xff] }
0x11c7   :  { %2381 = vmatpush3.bf16.msra.mxu0 %v2470_v14 }
0x1249   :  { %v1697_v4 = vpop.xlane.xlu1 %1696 }
0x124a   :  { %v1700_v38 = vmul.f32 0.0078125, %v1697_v4 }
0x124c   :  { %v1702_v5 = vsub.f32 %v1691_v1, %v1700_v38 }
0x124e   :  { %v1704_v6 = vmul.f32 %v1702_v5, %v1702_v5 }
0x1250   :  { %1707 = vadd.xlane.f32.xlu1 %v1704_v6 }
0x12dd   :  { %v1708_v27 = vpop.xlane.xlu1 %1707 }
0x12de   :  { %v1710_v28 = vmul.f32 0.0078125, %v1708_v27 }
0x12e0   :  { %v1712_v44 = vadd.f32 1e-05, %v1710_v28 }
0x12e2   :  { %2513 = vrsqrt.f32 %v1712_v44 }
0x12ec   :  { %v2514_v37 = vpop.eup %2513 }
0x12ed   :  { %v1716_v36 = vmul.f32 %v2514_v37, %v1702_v5 }
0x12ef   :  { %v1724_v41 = vmul.f32 %v2081_v34, %v1716_v36 }
0x12f1   :  { %v1732_v46 = vadd.f32 %v2082_v40, %v1724_v41 }
0x12f3   :  { %v1733_v7 = vpack.c.bf16 %v1732_v46, %v1731_v45 }
0x12f5   :  { %2383 = vmatmul.mubr.bf16.vlgmr.msra.gmra.mrb[52].mxu0 %v1733_v7 }
0x13c8   :  { %v1839_v32 = vpop.f32.mrb[52].mxu0 }
0x13c9   :  { %v1840_v49 = vadd.f32 %v2083_v58, %v1839_v32  ;;  %v2384_v50 = vpop.f32.mrb[53].mxu0 }
0x13ca   :  { %v1842_v51 = vpop.f32.mrb[54].mxu0 }
0x13cb   :  { %v1843_v30 = vadd.f32 %v2083_v58, %v1842_v51  ;;  %v2385_v52 = vpop.f32.mrb[55].mxu0  ;;  %v1846_v53 = vmax.f32 %v1840_v49, 0.0 }
0x13cd   :  { %v1847_v54 = vmax.f32 %v1843_v30, 0.0 }
0x13cf   :  { %v1848_v55 = vpack.c.bf16 %v1847_v54, %v1846_v53 }
0x13d1   :  { %2403 = vmatmul.mubr.bf16.vlgmr.msra.gmra.mrb[52].mxu1 %v1848_v55 }
0x14a4   :  { %v1954_v26 = vpop.f32.mrb[52].mxu1 }
0x14a5   :  { %v1955_v56 = vadd.f32 %v2092_v20, %v1954_v26  ;;  %v2404_v33 = vpop.f32.mrb[53].mxu1 }
0x14a6   :  { %v1957_v17 = vpop.f32.mrb[54].mxu1 }
0x14a7   :  { %v1958_v57 = vadd.f32 %v2092_v20, %v1957_v17  ;;  %v2405_v59 = vpop.f32.mrb[55].mxu1  ;;  %v1961_v60 = vadd.f32 %v1955_v56, %v1731_v45 }
0x14a9   :  { %1965 = vadd.xlane.f32.xlu1 %v1961_v60  ;;  %v1962_v61 = vadd.f32 %v1958_v57, %v1732_v46 }
0x14ad   :  { %1967 = vadd.xlane.f32.xlu1 %v1962_v61 }
0x1536   :  { %v1966_v62 = vpop.xlane.xlu1 %1965 }
0x1537   :  { %v1969_v63 = vmul.f32 0.0078125, %v1966_v62 }
0x1539   :  { %v1971_v23 = vsub.f32 %v1961_v60, %v1969_v63 }
0x153a   :  { %v1968_v24 = vpop.xlane.xlu1 %1967 }
0x153b   :  { %v1970_v0 = vmul.f32 0.0078125, %v1968_v24  ;;  %v1973_v9 = vmul.f32 %v1971_v23, %v1971_v23 }
0x153d   :  { %v1972_v8 = vsub.f32 %v1962_v61, %v1970_v0  ;;  %1975 = vadd.xlane.f32.xlu1 %v1973_v9 }
0x153f   :  { %v1974_v1 = vmul.f32 %v1972_v8, %v1972_v8 }
0x1541   :  { %1977 = vadd.xlane.f32.xlu1 %v1974_v1 }
0x15ca   :  { %v1976_v2 = vpop.xlane.xlu1 %1975 }
0x15cb   :  { %v1979_v3 = vmul.f32 0.0078125, %v1976_v2 }
0x15cd   :  { %v1981_v4 = vadd.f32 1e-05, %v1979_v3 }
0x15ce   :  { %v1978_v38 = vpop.xlane.xlu1 %1977 }
0x15cf   :  { %2515 = vrsqrt.f32 %v1981_v4  ;;  %v1980_v5 = vmul.f32 0.0078125, %v1978_v38 }
0x15d1   :  { %v1982_v6 = vadd.f32 1e-05, %v1980_v5 }
0x15d3   :  { %2517 = vrsqrt.f32 %v1982_v6 }
0x15d9   :  { %v2516_v10 = vpop.eup %2515 }
0x15da   :  { %v1985_v18 = vmul.f32 %v2516_v10, %v1971_v23 }
0x15dc   :  { %v1993_v13 = vmul.f32 %v2101_v11, %v1985_v18 }
0x15dd   :  { %v2518_v14 = vpop.eup %2517 }
0x15de   :  { %v1986_v43 = vmul.f32 %v2518_v14, %v1972_v8  ;;  %v2001_v15 = vadd.f32 %v2102_v12, %v1993_v13 }
0x15e0   :  { %v1994_v35 = vmul.f32 %v2101_v11, %v1986_v43  ;;  %2003 = vst [vmem:[#allocation11] sm:$0xff] %v2001_v15 }
0x15e2   :  { %v2002_v16 = vadd.f32 %v2102_v12, %v1994_v35 }
0x15e4   :  { %2004 = vst [vmem:[#allocation11 + $0x8] sm:$0xff] %v2002_v16 }
0x15e5   :  { %2640 = shalt.err (!%p2637_p2)
}
0x15e6   :  { %s2641_s21 = scalar_lea.hbm %s3173_s13, 256 }
0x15e7   :  { %p2642_p3 = scmp.ne.s32.totalorder %s3173_s13, %s2641_s21  ;;  %p2645_p4 = scmp.lt.u32.totalorder %s2641_s21, %s3173_s13 }
0x15e9   :  { %p2647_p5 = pnand %p2645_p4, %p2642_p3 }
0x15eb   :  { %2650 = shalt.err (!%p2647_p5)
}
0x15ec   :  { %2016 = dma.vmem_to_hbm [thread:$0]  %s2011_s18, 256, %s3173_s13, [#allocation4], %s2666_s7, %s2666_s7, %s2667_s23  }
0x15ed   :  { %2657 = dma.done.wait [#allocation4], 256  }
0x15ee   :  { %2658 = vsyncadd [#allocation4], 4294967040 }
0x15ef   :  { %2020 = vsyncpa [#allocation3], 1 }
0x15f0   :  { %2021 = vsyncpa [#allocation6], 1 }
0x15f1   :  { %2022 = vsyncpa [#allocation9], 1 }
0x15f2   :  { %2023 = vsyncpa [#allocation4], 1 }

</bundles_post_ra>
